<compile_context>
chip_gen: v7x
topology: tpu7x:2x2x1
jax: 0.10.0
libtpu: 0.0.40
codegen_flags: <defaults>
</compile_context>

<pallas_src>
import jax
import jax.numpy as jnp
from jax.experimental import pallas as pl
from jax.experimental.pallas import tpu as pltpu

NUM_PT = 4              # 4-point DLT -> 8x8 linear system
SUB = 8                 # sublanes per slab
LANE = 128              # lanes per slab
SLAB_B = SUB * LANE     # homographies per (8,128) slab (1024)
MAX_NSLAB = 8           # max slabs solved per grid step


def _recip(x):
    """1/x via the EUP approx reciprocal + one Newton-Raphson refinement."""
    r = pl.reciprocal(x, approx=True)
    return r * (2.0 - x * r)


def _make_dlt_kernel(pivot: bool):
    def dlt_kernel(src_ref, dst_ref, out_ref):
        """Solves nslab * 1024 independent 4-point DLT systems in registers.

        src_ref, dst_ref : (nslab, 8, SUB, LANE) f32 -- [x0,y0,...,x3,y3] slabs.
        out_ref          : (nslab, 9, SUB, LANE) f32 -- h0..h7 + fused row of 1s.
        """
        nslab = src_ref.shape[0]
        one = jnp.ones((SUB, LANE), jnp.float32)

        @pl.loop(0, nslab)
        def _(s):
            sp = src_ref[s]                        # (8, SUB, LANE)
            dp = dst_ref[s]
            x = [sp[2 * i] for i in range(NUM_PT)]
            y = [sp[2 * i + 1] for i in range(NUM_PT)]
            u = [dp[2 * i] for i in range(NUM_PT)]
            v = [dp[2 * i + 1] for i in range(NUM_PT)]

            # Row-reordered system: per point i,
            #   top:    x h0 + y h1 + h2 - x*u h6 - y*u h7 = u
            #   bottom: x h3 + y h4 + h5 - x*v h6 - y*v h7 = v
            # Both blocks share the 4x3 left block A = [x, y, 1], so a single
            # forward elimination of A (same per-lane pivots / multipliers) is
            # applied to both right-hand blocks at once:
            #   M[i] = [ x, y, 1 | -x*u, -y*u, u | -x*v, -y*v, v ]   (4 x 9)
            M = []
            for i in range(NUM_PT):
                nx, ny = -x[i], -y[i]
                M.append([x[i], y[i], one,
                          nx * u[i], ny * u[i], u[i],
                          nx * v[i], ny * v[i], v[i]])

            # ---- forward elimination of the shared 4x3 block (3 steps) ------
            # NOTE: near-zero pivots (collinear / degenerate points) produce
            # inf/nan, matching torch.inverse behaviour on singular systems.
            for k in range(3):
                if pivot:
                    # per-lane partial pivot search over rows k..3 (VPU only)
                    best_val = M[k][k]
                    best_abs = jnp.abs(best_val)
                    piv_idx = jnp.full((SUB, LANE), k, jnp.int32)
                    for r in range(k + 1, NUM_PT):
                        cand = jnp.abs(M[r][k])
                        take = cand > best_abs
                        best_abs = jnp.where(take, cand, best_abs)
                        best_val = jnp.where(take, M[r][k], best_val)
                        piv_idx = jnp.where(take, jnp.int32(r), piv_idx)
                    inv_piv = _recip(best_val)
                    old_kk = M[k][k]
                    factor = {r: jnp.where(piv_idx == r, old_kk, M[r][k])
                              for r in range(k + 1, NUM_PT)}
                else:
                    inv_piv = _recip(M[k][k])
                    factor = {r: M[r][k] for r in range(k + 1, NUM_PT)}

                # columns <= k are never read again; range(k+1, 9) is exactly
                # the remaining A columns plus both right-hand blocks.
                for c in range(k + 1, 9):
                    old_kc = M[k][c]
                    if pivot:
                        piv_c = old_kc
                        for r in range(k + 1, NUM_PT):
                            piv_c = jnp.where(piv_idx == r, M[r][c], piv_c)
                    else:
                        piv_c = old_kc
                    nrow = piv_c * inv_piv        # normalized pivot-row entry
                    M[k][c] = nrow
                    for r in range(k + 1, NUM_PT):
                        if pivot:
                            base = jnp.where(piv_idx == r, old_kc, M[r][c])
                        else:
                            base = M[r][c]
                        M[r][c] = base - factor[r] * nrow

            # ---- row 3 is fully eliminated: 2x2 system in (h6, h7) ----------
            a, b, e = M[3][3], M[3][4], M[3][5]     # top residual equation
            c, d, f = M[3][6], M[3][7], M[3][8]     # bottom residual equation
            inv_det = _recip(a * d - b * c)
            h6 = (e * d - b * f) * inv_det
            h7 = (a * f - e * c) * inv_det

            # ---- back-substitution (U has unit diagonal after normalization) -
            u01, u02, u12 = M[0][1], M[0][2], M[1][2]

            r2 = M[2][5] - M[2][3] * h6 - M[2][4] * h7
            r1 = M[1][5] - M[1][3] * h6 - M[1][4] * h7
            r0 = M[0][5] - M[0][3] * h6 - M[0][4] * h7
            h2 = r2
            h1 = r1 - u12 * h2
            h0 = r0 - u01 * h1 - u02 * h2

            s2 = M[2][8] - M[2][6] * h6 - M[2][7] * h7
            s1 = M[1][8] - M[1][6] * h6 - M[1][7] * h7
            s0 = M[0][8] - M[0][6] * h6 - M[0][7] * h7
            h5 = s2
            h4 = s1 - u12 * h5
            h3 = s0 - u01 * h4 - u02 * h5

            # lane-dense (9, 8, 128) writeback with the fused h22 = 1 row
            out_ref[s] = jnp.stack([h0, h1, h2, h3, h4, h5, h6, h7, one],
                                   axis=0)

    return dlt_kernel


_DLT_KERNELS = {True: _make_dlt_kernel(True), False: _make_dlt_kernel(False)}


def _choose_nslab(num_slabs):
    if num_slabs <= 1:
        return 1
    # Keep the grid >= 2 steps so the "parallel" axis can shard across the two
    # TensorCores of a v7x chip; cap per-step work at MAX_NSLAB slabs.
    return min(MAX_NSLAB, (num_slabs + 1) // 2)


def dlt(src_pt, dst_pt, *, pivot=True):
    """JAX/Pallas equivalent of DLT.forward: returns (B, 3, 3) homographies."""
    src_pt = jnp.asarray(src_pt, jnp.float32)
    dst_pt = jnp.asarray(dst_pt, jnp.float32)
    B = src_pt.shape[0]
    assert src_pt.shape == (B, NUM_PT, 2) and dst_pt.shape == (B, NUM_PT, 2)

    num_slabs = -(-B // SLAB_B)
    nslab = _choose_nslab(num_slabs)
    num_tiles = -(-num_slabs // nslab)
    total_slabs = num_tiles * nslab
    bp = total_slabs * SLAB_B
    pad = bp - B
    if pad:
        # pad with well-conditioned canonical corners (identity homography),
        # so padded lanes never hit a near-singular pivot.
        corners = jnp.array([[-1.0, -1.0], [1.0, -1.0], [1.0, 1.0], [-1.0, 1.0]],
                            dtype=jnp.float32)
        filler = jnp.broadcast_to(corners, (pad, NUM_PT, 2))
        src_p = jnp.concatenate([src_pt, filler], axis=0)
        dst_p = jnp.concatenate([dst_pt, filler], axis=0)
    else:
        src_p, dst_p = src_pt, dst_pt

    # batch index b -> (slab, sublane, lane); coordinates become lane-dense slabs
    # TODO(synk): producing/consuming the slab layout directly in surrounding
    # code would save one extra HBM pass over inputs/outputs (most useful on v5e).
    def to_slabs(p):
        return p.reshape(total_slabs, SUB, LANE, 2 * NUM_PT).transpose(0, 3, 1, 2)

    h9 = pl.pallas_call(
        _DLT_KERNELS[bool(pivot)],
        out_shape=jax.ShapeDtypeStruct((total_slabs, 2 * NUM_PT + 1, SUB, LANE),
                                       jnp.float32),
        grid_spec=pltpu.PrefetchScalarGridSpec(
            num_scalar_prefetch=0,
            grid=(num_tiles,),
            in_specs=[
                pl.BlockSpec((nslab, 2 * NUM_PT, SUB, LANE),
                             lambda i: (i, 0, 0, 0)),
                pl.BlockSpec((nslab, 2 * NUM_PT, SUB, LANE),
                             lambda i: (i, 0, 0, 0)),
            ],
            out_specs=pl.BlockSpec((nslab, 2 * NUM_PT + 1, SUB, LANE),
                                   lambda i: (i, 0, 0, 0)),
        ),
        compiler_params=pltpu.CompilerParams(
            dimension_semantics=("parallel",),
        ),
    )(to_slabs(src_p), to_slabs(dst_p))

    # (total_slabs, 9, SUB, LANE) -> (Bp, 9) -> (B, 3, 3); h22 = 1 already fused
    h = h9.transpose(0, 2, 3, 1).reshape(bp, 2 * NUM_PT + 1)[:B]
    return h.reshape(B, 3, 3)


def _reference_dlt(src_pt, dst_pt):
    """Pure-JAX reference mirroring the PyTorch module exactly."""
    B = src_pt.shape[0]
    rows, d = [], []
    for i in range(NUM_PT):
        x = src_pt[:, i, 0]; y = src_pt[:, i, 1]
        u = dst_pt[:, i, 0]; v = dst_pt[:, i, 1]
        one = jnp.ones_like(x); zero = jnp.zeros_like(x)
        rows.append(jnp.stack([x, y, one, zero, zero, zero, -x * u, -y * u], 1))
        rows.append(jnp.stack([zero, zero, zero, x, y, one, -x * v, -y * v], 1))
        d.append(u[:, None]); d.append(v[:, None])
    S = jnp.stack(rows, axis=1)                      # (B, 8, 8)
    D = jnp.concatenate(d, axis=1)[..., None]        # (B, 8, 1)
    h = jnp.linalg.solve(S, D)[..., 0]               # (B, 8)
    h9 = jnp.concatenate([h, jnp.ones((B, 1), h.dtype)], axis=1)
    return h9.reshape(B, 3, 3)


def _make_inputs(key, batch):
    k1, k2 = jax.random.split(key)
    corners = jnp.array([[-1.0, -1.0], [1.0, -1.0], [1.0, 1.0], [-1.0, 1.0]],
                        dtype=jnp.float32)
    src = corners[None] + 0.1 * jax.random.normal(k1, (batch, NUM_PT, 2),
                                                  jnp.float32)
    dst = corners[None] + 0.2 * jax.random.normal(k2, (batch, NUM_PT, 2),
                                                  jnp.float32)
    return src, dst


if __name__ == "__main__":
    # small test (single grid step, nslab = 1)
    batch_size = 2
    src_pt, dst_pt = _make_inputs(jax.random.PRNGKey(0), batch_size)
    H = dlt(src_pt, dst_pt)
    jax.block_until_ready(H)
    H_ref = _reference_dlt(src_pt, dst_pt)
    assert H.shape == (batch_size, 3, 3)
    assert jnp.allclose(H, H_ref, rtol=1e-4, atol=1e-4), (H, H_ref)

    # multi-slab / multi-tile test (nslab = 2, grid = 2, padded batch)
    batch_big = 2 * SLAB_B + 3
    src_b, dst_b = _make_inputs(jax.random.PRNGKey(1), batch_big)
    H_b = dlt(src_b, dst_b)
    jax.block_until_ready(H_b)
    H_b_ref = _reference_dlt(src_b, dst_b)
    assert H_b.shape == (batch_big, 3, 3)
    assert jnp.allclose(H_b, H_b_ref, rtol=5e-4, atol=5e-4)

    print("KERNEL_OK")
</pallas_src>

<mosaic_0001>
module attributes {stable_mosaic.version = 11 : i64} {
  func.func @dlt_kernel(%arg0: i32, %arg1: memref<1x8x8x128xf32, #tpu.memory_space<vmem>>, %arg2: memref<1x8x8x128xf32, #tpu.memory_space<vmem>>, %arg3: memref<1x9x8x128xf32, #tpu.memory_space<vmem>>) attributes {dimension_semantics = [#tpu.dimension_semantics<parallel>], iteration_bounds = array<i64: 1>, scalar_prefetch = 0 : i64, scratch_operands = 0 : i64, tpu.core_type = #tpu.core_type<tc>, window_params = [{transform_indices = @transform_0, window_bounds = array<i64: 1, 8, 8, 128>}, {transform_indices = @transform_1, window_bounds = array<i64: 1, 8, 8, 128>}, {transform_indices = @transform_2, window_bounds = array<i64: 1, 9, 8, 128>}]} {
    %cst = arith.constant 1.000000e+00 : f32
    %0 = vector.broadcast %cst : f32 to vector<8x128xf32>
    %c0_i32 = arith.constant 0 : i32
    %c1_i32 = arith.constant 1 : i32
    %1 = arith.muli %c0_i32, %c1_i32 : i32
    %c0_i32_0 = arith.constant 0 : i32
    %2 = arith.addi %c0_i32_0, %1 : i32
    %3 = arith.index_cast %2 : i32 to index
    %c0 = arith.constant 0 : index
    %c0_1 = arith.constant 0 : index
    %c0_2 = arith.constant 0 : index
    %4 = vector.load %arg1[%3, %c0, %c0_1, %c0_2] : memref<1x8x8x128xf32, #tpu.memory_space<vmem>>, vector<1x8x8x128xf32>
    %5 = vector.shape_cast %4 : vector<1x8x8x128xf32> to vector<8x8x128xf32>
    %6 = arith.index_cast %2 : i32 to index
    %c0_3 = arith.constant 0 : index
    %c0_4 = arith.constant 0 : index
    %c0_5 = arith.constant 0 : index
    %7 = vector.load %arg2[%6, %c0_3, %c0_4, %c0_5] : memref<1x8x8x128xf32, #tpu.memory_space<vmem>>, vector<1x8x8x128xf32>
    %8 = vector.shape_cast %7 : vector<1x8x8x128xf32> to vector<8x8x128xf32>
    %9 = vector.extract_strided_slice %5 {offsets = [0, 0, 0], sizes = [1, 8, 128], strides = [1, 1, 1]} : vector<8x8x128xf32> to vector<1x8x128xf32>
    %10 = vector.shape_cast %9 : vector<1x8x128xf32> to vector<8x128xf32>
    %11 = vector.extract_strided_slice %5 {offsets = [2, 0, 0], sizes = [1, 8, 128], strides = [1, 1, 1]} : vector<8x8x128xf32> to vector<1x8x128xf32>
    %12 = vector.shape_cast %11 : vector<1x8x128xf32> to vector<8x128xf32>
    %13 = vector.extract_strided_slice %5 {offsets = [4, 0, 0], sizes = [1, 8, 128], strides = [1, 1, 1]} : vector<8x8x128xf32> to vector<1x8x128xf32>
    %14 = vector.shape_cast %13 : vector<1x8x128xf32> to vector<8x128xf32>
    %15 = vector.extract_strided_slice %5 {offsets = [6, 0, 0], sizes = [1, 8, 128], strides = [1, 1, 1]} : vector<8x8x128xf32> to vector<1x8x128xf32>
    %16 = vector.shape_cast %15 : vector<1x8x128xf32> to vector<8x128xf32>
    %17 = vector.extract_strided_slice %5 {offsets = [1, 0, 0], sizes = [1, 8, 128], strides = [1, 1, 1]} : vector<8x8x128xf32> to vector<1x8x128xf32>
    %18 = vector.shape_cast %17 : vector<1x8x128xf32> to vector<8x128xf32>
    %19 = vector.extract_strided_slice %5 {offsets = [3, 0, 0], sizes = [1, 8, 128], strides = [1, 1, 1]} : vector<8x8x128xf32> to vector<1x8x128xf32>
    %20 = vector.shape_cast %19 : vector<1x8x128xf32> to vector<8x128xf32>
    %21 = vector.extract_strided_slice %5 {offsets = [5, 0, 0], sizes = [1, 8, 128], strides = [1, 1, 1]} : vector<8x8x128xf32> to vector<1x8x128xf32>
    %22 = vector.shape_cast %21 : vector<1x8x128xf32> to vector<8x128xf32>
    %23 = vector.extract_strided_slice %5 {offsets = [7, 0, 0], sizes = [1, 8, 128], strides = [1, 1, 1]} : vector<8x8x128xf32> to vector<1x8x128xf32>
    %24 = vector.shape_cast %23 : vector<1x8x128xf32> to vector<8x128xf32>
    %25 = vector.extract_strided_slice %8 {offsets = [0, 0, 0], sizes = [1, 8, 128], strides = [1, 1, 1]} : vector<8x8x128xf32> to vector<1x8x128xf32>
    %26 = vector.shape_cast %25 : vector<1x8x128xf32> to vector<8x128xf32>
    %27 = vector.extract_strided_slice %8 {offsets = [2, 0, 0], sizes = [1, 8, 128], strides = [1, 1, 1]} : vector<8x8x128xf32> to vector<1x8x128xf32>
    %28 = vector.shape_cast %27 : vector<1x8x128xf32> to vector<8x128xf32>
    %29 = vector.extract_strided_slice %8 {offsets = [4, 0, 0], sizes = [1, 8, 128], strides = [1, 1, 1]} : vector<8x8x128xf32> to vector<1x8x128xf32>
    %30 = vector.shape_cast %29 : vector<1x8x128xf32> to vector<8x128xf32>
    %31 = vector.extract_strided_slice %8 {offsets = [6, 0, 0], sizes = [1, 8, 128], strides = [1, 1, 1]} : vector<8x8x128xf32> to vector<1x8x128xf32>
    %32 = vector.shape_cast %31 : vector<1x8x128xf32> to vector<8x128xf32>
    %33 = vector.extract_strided_slice %8 {offsets = [1, 0, 0], sizes = [1, 8, 128], strides = [1, 1, 1]} : vector<8x8x128xf32> to vector<1x8x128xf32>
    %34 = vector.shape_cast %33 : vector<1x8x128xf32> to vector<8x128xf32>
    %35 = vector.extract_strided_slice %8 {offsets = [3, 0, 0], sizes = [1, 8, 128], strides = [1, 1, 1]} : vector<8x8x128xf32> to vector<1x8x128xf32>
    %36 = vector.shape_cast %35 : vector<1x8x128xf32> to vector<8x128xf32>
    %37 = vector.extract_strided_slice %8 {offsets = [5, 0, 0], sizes = [1, 8, 128], strides = [1, 1, 1]} : vector<8x8x128xf32> to vector<1x8x128xf32>
    %38 = vector.shape_cast %37 : vector<1x8x128xf32> to vector<8x128xf32>
    %39 = vector.extract_strided_slice %8 {offsets = [7, 0, 0], sizes = [1, 8, 128], strides = [1, 1, 1]} : vector<8x8x128xf32> to vector<1x8x128xf32>
    %40 = vector.shape_cast %39 : vector<1x8x128xf32> to vector<8x128xf32>
    %cst_6 = arith.constant 0.000000e+00 : f32
    %41 = vector.broadcast %cst_6 : f32 to vector<8x128xf32>
    %42 = arith.subf %41, %10 : vector<8x128xf32>
    %cst_7 = arith.constant 0.000000e+00 : f32
    %43 = vector.broadcast %cst_7 : f32 to vector<8x128xf32>
    %44 = arith.subf %43, %18 : vector<8x128xf32>
    %45 = arith.mulf %42, %26 : vector<8x128xf32>
    %46 = arith.mulf %44, %26 : vector<8x128xf32>
    %47 = arith.mulf %42, %34 : vector<8x128xf32>
    %48 = arith.mulf %44, %34 : vector<8x128xf32>
    %cst_8 = arith.constant 0.000000e+00 : f32
    %49 = vector.broadcast %cst_8 : f32 to vector<8x128xf32>
    %50 = arith.subf %49, %12 : vector<8x128xf32>
    %cst_9 = arith.constant 0.000000e+00 : f32
    %51 = vector.broadcast %cst_9 : f32 to vector<8x128xf32>
    %52 = arith.subf %51, %20 : vector<8x128xf32>
    %53 = arith.mulf %50, %28 : vector<8x128xf32>
    %54 = arith.mulf %52, %28 : vector<8x128xf32>
    %55 = arith.mulf %50, %36 : vector<8x128xf32>
    %56 = arith.mulf %52, %36 : vector<8x128xf32>
    %cst_10 = arith.constant 0.000000e+00 : f32
    %57 = vector.broadcast %cst_10 : f32 to vector<8x128xf32>
    %58 = arith.subf %57, %14 : vector<8x128xf32>
    %cst_11 = arith.constant 0.000000e+00 : f32
    %59 = vector.broadcast %cst_11 : f32 to vector<8x128xf32>
    %60 = arith.subf %59, %22 : vector<8x128xf32>
    %61 = arith.mulf %58, %30 : vector<8x128xf32>
    %62 = arith.mulf %60, %30 : vector<8x128xf32>
    %63 = arith.mulf %58, %38 : vector<8x128xf32>
    %64 = arith.mulf %60, %38 : vector<8x128xf32>
    %cst_12 = arith.constant 0.000000e+00 : f32
    %65 = vector.broadcast %cst_12 : f32 to vector<8x128xf32>
    %66 = arith.subf %65, %16 : vector<8x128xf32>
    %cst_13 = arith.constant 0.000000e+00 : f32
    %67 = vector.broadcast %cst_13 : f32 to vector<8x128xf32>
    %68 = arith.subf %67, %24 : vector<8x128xf32>
    %69 = arith.mulf %66, %32 : vector<8x128xf32>
    %70 = arith.mulf %68, %32 : vector<8x128xf32>
    %71 = arith.mulf %66, %40 : vector<8x128xf32>
    %72 = arith.mulf %68, %40 : vector<8x128xf32>
    %73 = math.absf %10 : vector<8x128xf32>
    %c0_i32_14 = arith.constant 0 : i32
    %74 = vector.broadcast %c0_i32_14 : i32 to vector<8x128xi32>
    %75 = math.absf %12 : vector<8x128xf32>
    %76 = arith.cmpf ogt, %75, %73 : vector<8x128xf32>
    %77 = arith.select %76, %75, %73 : vector<8x128xi1>, vector<8x128xf32>
    %78 = arith.select %76, %12, %10 : vector<8x128xi1>, vector<8x128xf32>
    %c1_i32_15 = arith.constant 1 : i32
    %79 = vector.broadcast %c1_i32_15 : i32 to vector<8x128xi32>
    %80 = arith.select %76, %79, %74 : vector<8x128xi1>, vector<8x128xi32>
    %81 = math.absf %14 : vector<8x128xf32>
    %82 = arith.cmpf ogt, %81, %77 : vector<8x128xf32>
    %83 = arith.select %82, %81, %77 : vector<8x128xi1>, vector<8x128xf32>
    %84 = arith.select %82, %14, %78 : vector<8x128xi1>, vector<8x128xf32>
    %c2_i32 = arith.constant 2 : i32
    %85 = vector.broadcast %c2_i32 : i32 to vector<8x128xi32>
    %86 = arith.select %82, %85, %80 : vector<8x128xi1>, vector<8x128xi32>
    %87 = math.absf %16 : vector<8x128xf32>
    %88 = arith.cmpf ogt, %87, %83 : vector<8x128xf32>
    %89 = arith.select %88, %16, %84 : vector<8x128xi1>, vector<8x128xf32>
    %c3_i32 = arith.constant 3 : i32
    %90 = vector.broadcast %c3_i32 : i32 to vector<8x128xi32>
    %91 = arith.select %88, %90, %86 : vector<8x128xi1>, vector<8x128xi32>
    %92 = tpu.reciprocal %89 {approx = true} : vector<8x128xf32> -> vector<8x128xf32>
    %93 = arith.mulf %89, %92 : vector<8x128xf32>
    %cst_16 = arith.constant 2.000000e+00 : f32
    %94 = vector.broadcast %cst_16 : f32 to vector<8x128xf32>
    %95 = arith.subf %94, %93 : vector<8x128xf32>
    %96 = arith.mulf %92, %95 : vector<8x128xf32>
    %c1_i32_17 = arith.constant 1 : i32
    %97 = vector.broadcast %c1_i32_17 : i32 to vector<8x128xi32>
    %98 = arith.cmpi eq, %91, %97 : vector<8x128xi32>
    %99 = arith.select %98, %10, %12 : vector<8x128xi1>, vector<8x128xf32>
    %c2_i32_18 = arith.constant 2 : i32
    %100 = vector.broadcast %c2_i32_18 : i32 to vector<8x128xi32>
    %101 = arith.cmpi eq, %91, %100 : vector<8x128xi32>
    %102 = arith.select %101, %10, %14 : vector<8x128xi1>, vector<8x128xf32>
    %c3_i32_19 = arith.constant 3 : i32
    %103 = vector.broadcast %c3_i32_19 : i32 to vector<8x128xi32>
    %104 = arith.cmpi eq, %91, %103 : vector<8x128xi32>
    %105 = arith.select %104, %10, %16 : vector<8x128xi1>, vector<8x128xf32>
    %c1_i32_20 = arith.constant 1 : i32
    %106 = vector.broadcast %c1_i32_20 : i32 to vector<8x128xi32>
    %107 = arith.cmpi eq, %91, %106 : vector<8x128xi32>
    %108 = arith.select %107, %20, %18 : vector<8x128xi1>, vector<8x128xf32>
    %c2_i32_21 = arith.constant 2 : i32
    %109 = vector.broadcast %c2_i32_21 : i32 to vector<8x128xi32>
    %110 = arith.cmpi eq, %91, %109 : vector<8x128xi32>
    %111 = arith.select %110, %22, %108 : vector<8x128xi1>, vector<8x128xf32>
    %c3_i32_22 = arith.constant 3 : i32
    %112 = vector.broadcast %c3_i32_22 : i32 to vector<8x128xi32>
    %113 = arith.cmpi eq, %91, %112 : vector<8x128xi32>
    %114 = arith.select %113, %24, %111 : vector<8x128xi1>, vector<8x128xf32>
    %115 = arith.mulf %114, %96 : vector<8x128xf32>
    %c1_i32_23 = arith.constant 1 : i32
    %116 = vector.broadcast %c1_i32_23 : i32 to vector<8x128xi32>
    %117 = arith.cmpi eq, %91, %116 : vector<8x128xi32>
    %118 = arith.select %117, %18, %20 : vector<8x128xi1>, vector<8x128xf32>
    %119 = arith.mulf %99, %115 : vector<8x128xf32>
    %120 = arith.subf %118, %119 : vector<8x128xf32>
    %c2_i32_24 = arith.constant 2 : i32
    %121 = vector.broadcast %c2_i32_24 : i32 to vector<8x128xi32>
    %122 = arith.cmpi eq, %91, %121 : vector<8x128xi32>
    %123 = arith.select %122, %18, %22 : vector<8x128xi1>, vector<8x128xf32>
    %124 = arith.mulf %102, %115 : vector<8x128xf32>
    %125 = arith.subf %123, %124 : vector<8x128xf32>
    %c3_i32_25 = arith.constant 3 : i32
    %126 = vector.broadcast %c3_i32_25 : i32 to vector<8x128xi32>
    %127 = arith.cmpi eq, %91, %126 : vector<8x128xi32>
    %128 = arith.select %127, %18, %24 : vector<8x128xi1>, vector<8x128xf32>
    %129 = arith.mulf %105, %115 : vector<8x128xf32>
    %130 = arith.subf %128, %129 : vector<8x128xf32>
    %c1_i32_26 = arith.constant 1 : i32
    %131 = vector.broadcast %c1_i32_26 : i32 to vector<8x128xi32>
    %132 = arith.cmpi eq, %91, %131 : vector<8x128xi32>
    %133 = arith.select %132, %0, %0 : vector<8x128xi1>, vector<8x128xf32>
    %c2_i32_27 = arith.constant 2 : i32
    %134 = vector.broadcast %c2_i32_27 : i32 to vector<8x128xi32>
    %135 = arith.cmpi eq, %91, %134 : vector<8x128xi32>
    %136 = arith.select %135, %0, %133 : vector<8x128xi1>, vector<8x128xf32>
    %c3_i32_28 = arith.constant 3 : i32
    %137 = vector.broadcast %c3_i32_28 : i32 to vector<8x128xi32>
    %138 = arith.cmpi eq, %91, %137 : vector<8x128xi32>
    %139 = arith.select %138, %0, %136 : vector<8x128xi1>, vector<8x128xf32>
    %140 = arith.mulf %139, %96 : vector<8x128xf32>
    %c1_i32_29 = arith.constant 1 : i32
    %141 = vector.broadcast %c1_i32_29 : i32 to vector<8x128xi32>
    %142 = arith.cmpi eq, %91, %141 : vector<8x128xi32>
    %143 = arith.select %142, %0, %0 : vector<8x128xi1>, vector<8x128xf32>
    %144 = arith.mulf %99, %140 : vector<8x128xf32>
    %145 = arith.subf %143, %144 : vector<8x128xf32>
    %c2_i32_30 = arith.constant 2 : i32
    %146 = vector.broadcast %c2_i32_30 : i32 to vector<8x128xi32>
    %147 = arith.cmpi eq, %91, %146 : vector<8x128xi32>
    %148 = arith.select %147, %0, %0 : vector<8x128xi1>, vector<8x128xf32>
    %149 = arith.mulf %102, %140 : vector<8x128xf32>
    %150 = arith.subf %148, %149 : vector<8x128xf32>
    %c3_i32_31 = arith.constant 3 : i32
    %151 = vector.broadcast %c3_i32_31 : i32 to vector<8x128xi32>
    %152 = arith.cmpi eq, %91, %151 : vector<8x128xi32>
    %153 = arith.select %152, %0, %0 : vector<8x128xi1>, vector<8x128xf32>
    %154 = arith.mulf %105, %140 : vector<8x128xf32>
    %155 = arith.subf %153, %154 : vector<8x128xf32>
    %c1_i32_32 = arith.constant 1 : i32
    %156 = vector.broadcast %c1_i32_32 : i32 to vector<8x128xi32>
    %157 = arith.cmpi eq, %91, %156 : vector<8x128xi32>
    %158 = arith.select %157, %53, %45 : vector<8x128xi1>, vector<8x128xf32>
    %c2_i32_33 = arith.constant 2 : i32
    %159 = vector.broadcast %c2_i32_33 : i32 to vector<8x128xi32>
    %160 = arith.cmpi eq, %91, %159 : vector<8x128xi32>
    %161 = arith.select %160, %61, %158 : vector<8x128xi1>, vector<8x128xf32>
    %c3_i32_34 = arith.constant 3 : i32
    %162 = vector.broadcast %c3_i32_34 : i32 to vector<8x128xi32>
    %163 = arith.cmpi eq, %91, %162 : vector<8x128xi32>
    %164 = arith.select %163, %69, %161 : vector<8x128xi1>, vector<8x128xf32>
    %165 = arith.mulf %164, %96 : vector<8x128xf32>
    %c1_i32_35 = arith.constant 1 : i32
    %166 = vector.broadcast %c1_i32_35 : i32 to vector<8x128xi32>
    %167 = arith.cmpi eq, %91, %166 : vector<8x128xi32>
    %168 = arith.select %167, %45, %53 : vector<8x128xi1>, vector<8x128xf32>
    %169 = arith.mulf %99, %165 : vector<8x128xf32>
    %170 = arith.subf %168, %169 : vector<8x128xf32>
    %c2_i32_36 = arith.constant 2 : i32
    %171 = vector.broadcast %c2_i32_36 : i32 to vector<8x128xi32>
    %172 = arith.cmpi eq, %91, %171 : vector<8x128xi32>
    %173 = arith.select %172, %45, %61 : vector<8x128xi1>, vector<8x128xf32>
    %174 = arith.mulf %102, %165 : vector<8x128xf32>
    %175 = arith.subf %173, %174 : vector<8x128xf32>
    %c3_i32_37 = arith.constant 3 : i32
    %176 = vector.broadcast %c3_i32_37 : i32 to vector<8x128xi32>
    %177 = arith.cmpi eq, %91, %176 : vector<8x128xi32>
    %178 = arith.select %177, %45, %69 : vector<8x128xi1>, vector<8x128xf32>
    %179 = arith.mulf %105, %165 : vector<8x128xf32>
    %180 = arith.subf %178, %179 : vector<8x128xf32>
    %c1_i32_38 = arith.constant 1 : i32
    %181 = vector.broadcast %c1_i32_38 : i32 to vector<8x128xi32>
    %182 = arith.cmpi eq, %91, %181 : vector<8x128xi32>
    %183 = arith.select %182, %54, %46 : vector<8x128xi1>, vector<8x128xf32>
    %c2_i32_39 = arith.constant 2 : i32
    %184 = vector.broadcast %c2_i32_39 : i32 to vector<8x128xi32>
    %185 = arith.cmpi eq, %91, %184 : vector<8x128xi32>
    %186 = arith.select %185, %62, %183 : vector<8x128xi1>, vector<8x128xf32>
    %c3_i32_40 = arith.constant 3 : i32
    %187 = vector.broadcast %c3_i32_40 : i32 to vector<8x128xi32>
    %188 = arith.cmpi eq, %91, %187 : vector<8x128xi32>
    %189 = arith.select %188, %70, %186 : vector<8x128xi1>, vector<8x128xf32>
    %190 = arith.mulf %189, %96 : vector<8x128xf32>
    %c1_i32_41 = arith.constant 1 : i32
    %191 = vector.broadcast %c1_i32_41 : i32 to vector<8x128xi32>
    %192 = arith.cmpi eq, %91, %191 : vector<8x128xi32>
    %193 = arith.select %192, %46, %54 : vector<8x128xi1>, vector<8x128xf32>
    %194 = arith.mulf %99, %190 : vector<8x128xf32>
    %195 = arith.subf %193, %194 : vector<8x128xf32>
    %c2_i32_42 = arith.constant 2 : i32
    %196 = vector.broadcast %c2_i32_42 : i32 to vector<8x128xi32>
    %197 = arith.cmpi eq, %91, %196 : vector<8x128xi32>
    %198 = arith.select %197, %46, %62 : vector<8x128xi1>, vector<8x128xf32>
    %199 = arith.mulf %102, %190 : vector<8x128xf32>
    %200 = arith.subf %198, %199 : vector<8x128xf32>
    %c3_i32_43 = arith.constant 3 : i32
    %201 = vector.broadcast %c3_i32_43 : i32 to vector<8x128xi32>
    %202 = arith.cmpi eq, %91, %201 : vector<8x128xi32>
    %203 = arith.select %202, %46, %70 : vector<8x128xi1>, vector<8x128xf32>
    %204 = arith.mulf %105, %190 : vector<8x128xf32>
    %205 = arith.subf %203, %204 : vector<8x128xf32>
    %c1_i32_44 = arith.constant 1 : i32
    %206 = vector.broadcast %c1_i32_44 : i32 to vector<8x128xi32>
    %207 = arith.cmpi eq, %91, %206 : vector<8x128xi32>
    %208 = arith.select %207, %28, %26 : vector<8x128xi1>, vector<8x128xf32>
    %c2_i32_45 = arith.constant 2 : i32
    %209 = vector.broadcast %c2_i32_45 : i32 to vector<8x128xi32>
    %210 = arith.cmpi eq, %91, %209 : vector<8x128xi32>
    %211 = arith.select %210, %30, %208 : vector<8x128xi1>, vector<8x128xf32>
    %c3_i32_46 = arith.constant 3 : i32
    %212 = vector.broadcast %c3_i32_46 : i32 to vector<8x128xi32>
    %213 = arith.cmpi eq, %91, %212 : vector<8x128xi32>
    %214 = arith.select %213, %32, %211 : vector<8x128xi1>, vector<8x128xf32>
    %215 = arith.mulf %214, %96 : vector<8x128xf32>
    %c1_i32_47 = arith.constant 1 : i32
    %216 = vector.broadcast %c1_i32_47 : i32 to vector<8x128xi32>
    %217 = arith.cmpi eq, %91, %216 : vector<8x128xi32>
    %218 = arith.select %217, %26, %28 : vector<8x128xi1>, vector<8x128xf32>
    %219 = arith.mulf %99, %215 : vector<8x128xf32>
    %220 = arith.subf %218, %219 : vector<8x128xf32>
    %c2_i32_48 = arith.constant 2 : i32
    %221 = vector.broadcast %c2_i32_48 : i32 to vector<8x128xi32>
    %222 = arith.cmpi eq, %91, %221 : vector<8x128xi32>
    %223 = arith.select %222, %26, %30 : vector<8x128xi1>, vector<8x128xf32>
    %224 = arith.mulf %102, %215 : vector<8x128xf32>
    %225 = arith.subf %223, %224 : vector<8x128xf32>
    %c3_i32_49 = arith.constant 3 : i32
    %226 = vector.broadcast %c3_i32_49 : i32 to vector<8x128xi32>
    %227 = arith.cmpi eq, %91, %226 : vector<8x128xi32>
    %228 = arith.select %227, %26, %32 : vector<8x128xi1>, vector<8x128xf32>
    %229 = arith.mulf %105, %215 : vector<8x128xf32>
    %230 = arith.subf %228, %229 : vector<8x128xf32>
    %c1_i32_50 = arith.constant 1 : i32
    %231 = vector.broadcast %c1_i32_50 : i32 to vector<8x128xi32>
    %232 = arith.cmpi eq, %91, %231 : vector<8x128xi32>
    %233 = arith.select %232, %55, %47 : vector<8x128xi1>, vector<8x128xf32>
    %c2_i32_51 = arith.constant 2 : i32
    %234 = vector.broadcast %c2_i32_51 : i32 to vector<8x128xi32>
    %235 = arith.cmpi eq, %91, %234 : vector<8x128xi32>
    %236 = arith.select %235, %63, %233 : vector<8x128xi1>, vector<8x128xf32>
    %c3_i32_52 = arith.constant 3 : i32
    %237 = vector.broadcast %c3_i32_52 : i32 to vector<8x128xi32>
    %238 = arith.cmpi eq, %91, %237 : vector<8x128xi32>
    %239 = arith.select %238, %71, %236 : vector<8x128xi1>, vector<8x128xf32>
    %240 = arith.mulf %239, %96 : vector<8x128xf32>
    %c1_i32_53 = arith.constant 1 : i32
    %241 = vector.broadcast %c1_i32_53 : i32 to vector<8x128xi32>
    %242 = arith.cmpi eq, %91, %241 : vector<8x128xi32>
    %243 = arith.select %242, %47, %55 : vector<8x128xi1>, vector<8x128xf32>
    %244 = arith.mulf %99, %240 : vector<8x128xf32>
    %245 = arith.subf %243, %244 : vector<8x128xf32>
    %c2_i32_54 = arith.constant 2 : i32
    %246 = vector.broadcast %c2_i32_54 : i32 to vector<8x128xi32>
    %247 = arith.cmpi eq, %91, %246 : vector<8x128xi32>
    %248 = arith.select %247, %47, %63 : vector<8x128xi1>, vector<8x128xf32>
    %249 = arith.mulf %102, %240 : vector<8x128xf32>
    %250 = arith.subf %248, %249 : vector<8x128xf32>
    %c3_i32_55 = arith.constant 3 : i32
    %251 = vector.broadcast %c3_i32_55 : i32 to vector<8x128xi32>
    %252 = arith.cmpi eq, %91, %251 : vector<8x128xi32>
    %253 = arith.select %252, %47, %71 : vector<8x128xi1>, vector<8x128xf32>
    %254 = arith.mulf %105, %240 : vector<8x128xf32>
    %255 = arith.subf %253, %254 : vector<8x128xf32>
    %c1_i32_56 = arith.constant 1 : i32
    %256 = vector.broadcast %c1_i32_56 : i32 to vector<8x128xi32>
    %257 = arith.cmpi eq, %91, %256 : vector<8x128xi32>
    %258 = arith.select %257, %56, %48 : vector<8x128xi1>, vector<8x128xf32>
    %c2_i32_57 = arith.constant 2 : i32
    %259 = vector.broadcast %c2_i32_57 : i32 to vector<8x128xi32>
    %260 = arith.cmpi eq, %91, %259 : vector<8x128xi32>
    %261 = arith.select %260, %64, %258 : vector<8x128xi1>, vector<8x128xf32>
    %c3_i32_58 = arith.constant 3 : i32
    %262 = vector.broadcast %c3_i32_58 : i32 to vector<8x128xi32>
    %263 = arith.cmpi eq, %91, %262 : vector<8x128xi32>
    %264 = arith.select %263, %72, %261 : vector<8x128xi1>, vector<8x128xf32>
    %265 = arith.mulf %264, %96 : vector<8x128xf32>
    %c1_i32_59 = arith.constant 1 : i32
    %266 = vector.broadcast %c1_i32_59 : i32 to vector<8x128xi32>
    %267 = arith.cmpi eq, %91, %266 : vector<8x128xi32>
    %268 = arith.select %267, %48, %56 : vector<8x128xi1>, vector<8x128xf32>
    %269 = arith.mulf %99, %265 : vector<8x128xf32>
    %270 = arith.subf %268, %269 : vector<8x128xf32>
    %c2_i32_60 = arith.constant 2 : i32
    %271 = vector.broadcast %c2_i32_60 : i32 to vector<8x128xi32>
    %272 = arith.cmpi eq, %91, %271 : vector<8x128xi32>
    %273 = arith.select %272, %48, %64 : vector<8x128xi1>, vector<8x128xf32>
    %274 = arith.mulf %102, %265 : vector<8x128xf32>
    %275 = arith.subf %273, %274 : vector<8x128xf32>
    %c3_i32_61 = arith.constant 3 : i32
    %276 = vector.broadcast %c3_i32_61 : i32 to vector<8x128xi32>
    %277 = arith.cmpi eq, %91, %276 : vector<8x128xi32>
    %278 = arith.select %277, %48, %72 : vector<8x128xi1>, vector<8x128xf32>
    %279 = arith.mulf %105, %265 : vector<8x128xf32>
    %280 = arith.subf %278, %279 : vector<8x128xf32>
    %c1_i32_62 = arith.constant 1 : i32
    %281 = vector.broadcast %c1_i32_62 : i32 to vector<8x128xi32>
    %282 = arith.cmpi eq, %91, %281 : vector<8x128xi32>
    %283 = arith.select %282, %36, %34 : vector<8x128xi1>, vector<8x128xf32>
    %c2_i32_63 = arith.constant 2 : i32
    %284 = vector.broadcast %c2_i32_63 : i32 to vector<8x128xi32>
    %285 = arith.cmpi eq, %91, %284 : vector<8x128xi32>
    %286 = arith.select %285, %38, %283 : vector<8x128xi1>, vector<8x128xf32>
    %c3_i32_64 = arith.constant 3 : i32
    %287 = vector.broadcast %c3_i32_64 : i32 to vector<8x128xi32>
    %288 = arith.cmpi eq, %91, %287 : vector<8x128xi32>
    %289 = arith.select %288, %40, %286 : vector<8x128xi1>, vector<8x128xf32>
    %290 = arith.mulf %289, %96 : vector<8x128xf32>
    %c1_i32_65 = arith.constant 1 : i32
    %291 = vector.broadcast %c1_i32_65 : i32 to vector<8x128xi32>
    %292 = arith.cmpi eq, %91, %291 : vector<8x128xi32>
    %293 = arith.select %292, %34, %36 : vector<8x128xi1>, vector<8x128xf32>
    %294 = arith.mulf %99, %290 : vector<8x128xf32>
    %295 = arith.subf %293, %294 : vector<8x128xf32>
    %c2_i32_66 = arith.constant 2 : i32
    %296 = vector.broadcast %c2_i32_66 : i32 to vector<8x128xi32>
    %297 = arith.cmpi eq, %91, %296 : vector<8x128xi32>
    %298 = arith.select %297, %34, %38 : vector<8x128xi1>, vector<8x128xf32>
    %299 = arith.mulf %102, %290 : vector<8x128xf32>
    %300 = arith.subf %298, %299 : vector<8x128xf32>
    %c3_i32_67 = arith.constant 3 : i32
    %301 = vector.broadcast %c3_i32_67 : i32 to vector<8x128xi32>
    %302 = arith.cmpi eq, %91, %301 : vector<8x128xi32>
    %303 = arith.select %302, %34, %40 : vector<8x128xi1>, vector<8x128xf32>
    %304 = arith.mulf %105, %290 : vector<8x128xf32>
    %305 = arith.subf %303, %304 : vector<8x128xf32>
    %306 = math.absf %120 : vector<8x128xf32>
    %c1_i32_68 = arith.constant 1 : i32
    %307 = vector.broadcast %c1_i32_68 : i32 to vector<8x128xi32>
    %308 = math.absf %125 : vector<8x128xf32>
    %309 = arith.cmpf ogt, %308, %306 : vector<8x128xf32>
    %310 = arith.select %309, %308, %306 : vector<8x128xi1>, vector<8x128xf32>
    %311 = arith.select %309, %125, %120 : vector<8x128xi1>, vector<8x128xf32>
    %c2_i32_69 = arith.constant 2 : i32
    %312 = vector.broadcast %c2_i32_69 : i32 to vector<8x128xi32>
    %313 = arith.select %309, %312, %307 : vector<8x128xi1>, vector<8x128xi32>
    %314 = math.absf %130 : vector<8x128xf32>
    %315 = arith.cmpf ogt, %314, %310 : vector<8x128xf32>
    %316 = arith.select %315, %130, %311 : vector<8x128xi1>, vector<8x128xf32>
    %c3_i32_70 = arith.constant 3 : i32
    %317 = vector.broadcast %c3_i32_70 : i32 to vector<8x128xi32>
    %318 = arith.select %315, %317, %313 : vector<8x128xi1>, vector<8x128xi32>
    %319 = tpu.reciprocal %316 {approx = true} : vector<8x128xf32> -> vector<8x128xf32>
    %320 = arith.mulf %316, %319 : vector<8x128xf32>
    %cst_71 = arith.constant 2.000000e+00 : f32
    %321 = vector.broadcast %cst_71 : f32 to vector<8x128xf32>
    %322 = arith.subf %321, %320 : vector<8x128xf32>
    %323 = arith.mulf %319, %322 : vector<8x128xf32>
    %c2_i32_72 = arith.constant 2 : i32
    %324 = vector.broadcast %c2_i32_72 : i32 to vector<8x128xi32>
    %325 = arith.cmpi eq, %318, %324 : vector<8x128xi32>
    %326 = arith.select %325, %120, %125 : vector<8x128xi1>, vector<8x128xf32>
    %c3_i32_73 = arith.constant 3 : i32
    %327 = vector.broadcast %c3_i32_73 : i32 to vector<8x128xi32>
    %328 = arith.cmpi eq, %318, %327 : vector<8x128xi32>
    %329 = arith.select %328, %120, %130 : vector<8x128xi1>, vector<8x128xf32>
    %c2_i32_74 = arith.constant 2 : i32
    %330 = vector.broadcast %c2_i32_74 : i32 to vector<8x128xi32>
    %331 = arith.cmpi eq, %318, %330 : vector<8x128xi32>
    %332 = arith.select %331, %150, %145 : vector<8x128xi1>, vector<8x128xf32>
    %c3_i32_75 = arith.constant 3 : i32
    %333 = vector.broadcast %c3_i32_75 : i32 to vector<8x128xi32>
    %334 = arith.cmpi eq, %318, %333 : vector<8x128xi32>
    %335 = arith.select %334, %155, %332 : vector<8x128xi1>, vector<8x128xf32>
    %336 = arith.mulf %335, %323 : vector<8x128xf32>
    %c2_i32_76 = arith.constant 2 : i32
    %337 = vector.broadcast %c2_i32_76 : i32 to vector<8x128xi32>
    %338 = arith.cmpi eq, %318, %337 : vector<8x128xi32>
    %339 = arith.select %338, %145, %150 : vector<8x128xi1>, vector<8x128xf32>
    %340 = arith.mulf %326, %336 : vector<8x128xf32>
    %341 = arith.subf %339, %340 : vector<8x128xf32>
    %c3_i32_77 = arith.constant 3 : i32
    %342 = vector.broadcast %c3_i32_77 : i32 to vector<8x128xi32>
    %343 = arith.cmpi eq, %318, %342 : vector<8x128xi32>
    %344 = arith.select %343, %145, %155 : vector<8x128xi1>, vector<8x128xf32>
    %345 = arith.mulf %329, %336 : vector<8x128xf32>
    %346 = arith.subf %344, %345 : vector<8x128xf32>
    %c2_i32_78 = arith.constant 2 : i32
    %347 = vector.broadcast %c2_i32_78 : i32 to vector<8x128xi32>
    %348 = arith.cmpi eq, %318, %347 : vector<8x128xi32>
    %349 = arith.select %348, %175, %170 : vector<8x128xi1>, vector<8x128xf32>
    %c3_i32_79 = arith.constant 3 : i32
    %350 = vector.broadcast %c3_i32_79 : i32 to vector<8x128xi32>
    %351 = arith.cmpi eq, %318, %350 : vector<8x128xi32>
    %352 = arith.select %351, %180, %349 : vector<8x128xi1>, vector<8x128xf32>
    %353 = arith.mulf %352, %323 : vector<8x128xf32>
    %c2_i32_80 = arith.constant 2 : i32
    %354 = vector.broadcast %c2_i32_80 : i32 to vector<8x128xi32>
    %355 = arith.cmpi eq, %318, %354 : vector<8x128xi32>
    %356 = arith.select %355, %170, %175 : vector<8x128xi1>, vector<8x128xf32>
    %357 = arith.mulf %326, %353 : vector<8x128xf32>
    %358 = arith.subf %356, %357 : vector<8x128xf32>
    %c3_i32_81 = arith.constant 3 : i32
    %359 = vector.broadcast %c3_i32_81 : i32 to vector<8x128xi32>
    %360 = arith.cmpi eq, %318, %359 : vector<8x128xi32>
    %361 = arith.select %360, %170, %180 : vector<8x128xi1>, vector<8x128xf32>
    %362 = arith.mulf %329, %353 : vector<8x128xf32>
    %363 = arith.subf %361, %362 : vector<8x128xf32>
    %c2_i32_82 = arith.constant 2 : i32
    %364 = vector.broadcast %c2_i32_82 : i32 to vector<8x128xi32>
    %365 = arith.cmpi eq, %318, %364 : vector<8x128xi32>
    %366 = arith.select %365, %200, %195 : vector<8x128xi1>, vector<8x128xf32>
    %c3_i32_83 = arith.constant 3 : i32
    %367 = vector.broadcast %c3_i32_83 : i32 to vector<8x128xi32>
    %368 = arith.cmpi eq, %318, %367 : vector<8x128xi32>
    %369 = arith.select %368, %205, %366 : vector<8x128xi1>, vector<8x128xf32>
    %370 = arith.mulf %369, %323 : vector<8x128xf32>
    %c2_i32_84 = arith.constant 2 : i32
    %371 = vector.broadcast %c2_i32_84 : i32 to vector<8x128xi32>
    %372 = arith.cmpi eq, %318, %371 : vector<8x128xi32>
    %373 = arith.select %372, %195, %200 : vector<8x128xi1>, vector<8x128xf32>
    %374 = arith.mulf %326, %370 : vector<8x128xf32>
    %375 = arith.subf %373, %374 : vector<8x128xf32>
    %c3_i32_85 = arith.constant 3 : i32
    %376 = vector.broadcast %c3_i32_85 : i32 to vector<8x128xi32>
    %377 = arith.cmpi eq, %318, %376 : vector<8x128xi32>
    %378 = arith.select %377, %195, %205 : vector<8x128xi1>, vector<8x128xf32>
    %379 = arith.mulf %329, %370 : vector<8x128xf32>
    %380 = arith.subf %378, %379 : vector<8x128xf32>
    %c2_i32_86 = arith.constant 2 : i32
    %381 = vector.broadcast %c2_i32_86 : i32 to vector<8x128xi32>
    %382 = arith.cmpi eq, %318, %381 : vector<8x128xi32>
    %383 = arith.select %382, %225, %220 : vector<8x128xi1>, vector<8x128xf32>
    %c3_i32_87 = arith.constant 3 : i32
    %384 = vector.broadcast %c3_i32_87 : i32 to vector<8x128xi32>
    %385 = arith.cmpi eq, %318, %384 : vector<8x128xi32>
    %386 = arith.select %385, %230, %383 : vector<8x128xi1>, vector<8x128xf32>
    %387 = arith.mulf %386, %323 : vector<8x128xf32>
    %c2_i32_88 = arith.constant 2 : i32
    %388 = vector.broadcast %c2_i32_88 : i32 to vector<8x128xi32>
    %389 = arith.cmpi eq, %318, %388 : vector<8x128xi32>
    %390 = arith.select %389, %220, %225 : vector<8x128xi1>, vector<8x128xf32>
    %391 = arith.mulf %326, %387 : vector<8x128xf32>
    %392 = arith.subf %390, %391 : vector<8x128xf32>
    %c3_i32_89 = arith.constant 3 : i32
    %393 = vector.broadcast %c3_i32_89 : i32 to vector<8x128xi32>
    %394 = arith.cmpi eq, %318, %393 : vector<8x128xi32>
    %395 = arith.select %394, %220, %230 : vector<8x128xi1>, vector<8x128xf32>
    %396 = arith.mulf %329, %387 : vector<8x128xf32>
    %397 = arith.subf %395, %396 : vector<8x128xf32>
    %c2_i32_90 = arith.constant 2 : i32
    %398 = vector.broadcast %c2_i32_90 : i32 to vector<8x128xi32>
    %399 = arith.cmpi eq, %318, %398 : vector<8x128xi32>
    %400 = arith.select %399, %250, %245 : vector<8x128xi1>, vector<8x128xf32>
    %c3_i32_91 = arith.constant 3 : i32
    %401 = vector.broadcast %c3_i32_91 : i32 to vector<8x128xi32>
    %402 = arith.cmpi eq, %318, %401 : vector<8x128xi32>
    %403 = arith.select %402, %255, %400 : vector<8x128xi1>, vector<8x128xf32>
    %404 = arith.mulf %403, %323 : vector<8x128xf32>
    %c2_i32_92 = arith.constant 2 : i32
    %405 = vector.broadcast %c2_i32_92 : i32 to vector<8x128xi32>
    %406 = arith.cmpi eq, %318, %405 : vector<8x128xi32>
    %407 = arith.select %406, %245, %250 : vector<8x128xi1>, vector<8x128xf32>
    %408 = arith.mulf %326, %404 : vector<8x128xf32>
    %409 = arith.subf %407, %408 : vector<8x128xf32>
    %c3_i32_93 = arith.constant 3 : i32
    %410 = vector.broadcast %c3_i32_93 : i32 to vector<8x128xi32>
    %411 = arith.cmpi eq, %318, %410 : vector<8x128xi32>
    %412 = arith.select %411, %245, %255 : vector<8x128xi1>, vector<8x128xf32>
    %413 = arith.mulf %329, %404 : vector<8x128xf32>
    %414 = arith.subf %412, %413 : vector<8x128xf32>
    %c2_i32_94 = arith.constant 2 : i32
    %415 = vector.broadcast %c2_i32_94 : i32 to vector<8x128xi32>
    %416 = arith.cmpi eq, %318, %415 : vector<8x128xi32>
    %417 = arith.select %416, %275, %270 : vector<8x128xi1>, vector<8x128xf32>
    %c3_i32_95 = arith.constant 3 : i32
    %418 = vector.broadcast %c3_i32_95 : i32 to vector<8x128xi32>
    %419 = arith.cmpi eq, %318, %418 : vector<8x128xi32>
    %420 = arith.select %419, %280, %417 : vector<8x128xi1>, vector<8x128xf32>
    %421 = arith.mulf %420, %323 : vector<8x128xf32>
    %c2_i32_96 = arith.constant 2 : i32
    %422 = vector.broadcast %c2_i32_96 : i32 to vector<8x128xi32>
    %423 = arith.cmpi eq, %318, %422 : vector<8x128xi32>
    %424 = arith.select %423, %270, %275 : vector<8x128xi1>, vector<8x128xf32>
    %425 = arith.mulf %326, %421 : vector<8x128xf32>
    %426 = arith.subf %424, %425 : vector<8x128xf32>
    %c3_i32_97 = arith.constant 3 : i32
    %427 = vector.broadcast %c3_i32_97 : i32 to vector<8x128xi32>
    %428 = arith.cmpi eq, %318, %427 : vector<8x128xi32>
    %429 = arith.select %428, %270, %280 : vector<8x128xi1>, vector<8x128xf32>
    %430 = arith.mulf %329, %421 : vector<8x128xf32>
    %431 = arith.subf %429, %430 : vector<8x128xf32>
    %c2_i32_98 = arith.constant 2 : i32
    %432 = vector.broadcast %c2_i32_98 : i32 to vector<8x128xi32>
    %433 = arith.cmpi eq, %318, %432 : vector<8x128xi32>
    %434 = arith.select %433, %300, %295 : vector<8x128xi1>, vector<8x128xf32>
    %c3_i32_99 = arith.constant 3 : i32
    %435 = vector.broadcast %c3_i32_99 : i32 to vector<8x128xi32>
    %436 = arith.cmpi eq, %318, %435 : vector<8x128xi32>
    %437 = arith.select %436, %305, %434 : vector<8x128xi1>, vector<8x128xf32>
    %438 = arith.mulf %437, %323 : vector<8x128xf32>
    %c2_i32_100 = arith.constant 2 : i32
    %439 = vector.broadcast %c2_i32_100 : i32 to vector<8x128xi32>
    %440 = arith.cmpi eq, %318, %439 : vector<8x128xi32>
    %441 = arith.select %440, %295, %300 : vector<8x128xi1>, vector<8x128xf32>
    %442 = arith.mulf %326, %438 : vector<8x128xf32>
    %443 = arith.subf %441, %442 : vector<8x128xf32>
    %c3_i32_101 = arith.constant 3 : i32
    %444 = vector.broadcast %c3_i32_101 : i32 to vector<8x128xi32>
    %445 = arith.cmpi eq, %318, %444 : vector<8x128xi32>
    %446 = arith.select %445, %295, %305 : vector<8x128xi1>, vector<8x128xf32>
    %447 = arith.mulf %329, %438 : vector<8x128xf32>
    %448 = arith.subf %446, %447 : vector<8x128xf32>
    %449 = math.absf %341 : vector<8x128xf32>
    %c2_i32_102 = arith.constant 2 : i32
    %450 = vector.broadcast %c2_i32_102 : i32 to vector<8x128xi32>
    %451 = math.absf %346 : vector<8x128xf32>
    %452 = arith.cmpf ogt, %451, %449 : vector<8x128xf32>
    %453 = arith.select %452, %346, %341 : vector<8x128xi1>, vector<8x128xf32>
    %c3_i32_103 = arith.constant 3 : i32
    %454 = vector.broadcast %c3_i32_103 : i32 to vector<8x128xi32>
    %455 = arith.select %452, %454, %450 : vector<8x128xi1>, vector<8x128xi32>
    %456 = tpu.reciprocal %453 {approx = true} : vector<8x128xf32> -> vector<8x128xf32>
    %457 = arith.mulf %453, %456 : vector<8x128xf32>
    %cst_104 = arith.constant 2.000000e+00 : f32
    %458 = vector.broadcast %cst_104 : f32 to vector<8x128xf32>
    %459 = arith.subf %458, %457 : vector<8x128xf32>
    %460 = arith.mulf %456, %459 : vector<8x128xf32>
    %c3_i32_105 = arith.constant 3 : i32
    %461 = vector.broadcast %c3_i32_105 : i32 to vector<8x128xi32>
    %462 = arith.cmpi eq, %455, %461 : vector<8x128xi32>
    %463 = arith.select %462, %341, %346 : vector<8x128xi1>, vector<8x128xf32>
    %c3_i32_106 = arith.constant 3 : i32
    %464 = vector.broadcast %c3_i32_106 : i32 to vector<8x128xi32>
    %465 = arith.cmpi eq, %455, %464 : vector<8x128xi32>
    %466 = arith.select %465, %363, %358 : vector<8x128xi1>, vector<8x128xf32>
    %467 = arith.mulf %466, %460 : vector<8x128xf32>
    %c3_i32_107 = arith.constant 3 : i32
    %468 = vector.broadcast %c3_i32_107 : i32 to vector<8x128xi32>
    %469 = arith.cmpi eq, %455, %468 : vector<8x128xi32>
    %470 = arith.select %469, %358, %363 : vector<8x128xi1>, vector<8x128xf32>
    %471 = arith.mulf %463, %467 : vector<8x128xf32>
    %472 = arith.subf %470, %471 : vector<8x128xf32>
    %c3_i32_108 = arith.constant 3 : i32
    %473 = vector.broadcast %c3_i32_108 : i32 to vector<8x128xi32>
    %474 = arith.cmpi eq, %455, %473 : vector<8x128xi32>
    %475 = arith.select %474, %380, %375 : vector<8x128xi1>, vector<8x128xf32>
    %476 = arith.mulf %475, %460 : vector<8x128xf32>
    %c3_i32_109 = arith.constant 3 : i32
    %477 = vector.broadcast %c3_i32_109 : i32 to vector<8x128xi32>
    %478 = arith.cmpi eq, %455, %477 : vector<8x128xi32>
    %479 = arith.select %478, %375, %380 : vector<8x128xi1>, vector<8x128xf32>
    %480 = arith.mulf %463, %476 : vector<8x128xf32>
    %481 = arith.subf %479, %480 : vector<8x128xf32>
    %c3_i32_110 = arith.constant 3 : i32
    %482 = vector.broadcast %c3_i32_110 : i32 to vector<8x128xi32>
    %483 = arith.cmpi eq, %455, %482 : vector<8x128xi32>
    %484 = arith.select %483, %397, %392 : vector<8x128xi1>, vector<8x128xf32>
    %485 = arith.mulf %484, %460 : vector<8x128xf32>
    %c3_i32_111 = arith.constant 3 : i32
    %486 = vector.broadcast %c3_i32_111 : i32 to vector<8x128xi32>
    %487 = arith.cmpi eq, %455, %486 : vector<8x128xi32>
    %488 = arith.select %487, %392, %397 : vector<8x128xi1>, vector<8x128xf32>
    %489 = arith.mulf %463, %485 : vector<8x128xf32>
    %490 = arith.subf %488, %489 : vector<8x128xf32>
    %c3_i32_112 = arith.constant 3 : i32
    %491 = vector.broadcast %c3_i32_112 : i32 to vector<8x128xi32>
    %492 = arith.cmpi eq, %455, %491 : vector<8x128xi32>
    %493 = arith.select %492, %414, %409 : vector<8x128xi1>, vector<8x128xf32>
    %494 = arith.mulf %493, %460 : vector<8x128xf32>
    %c3_i32_113 = arith.constant 3 : i32
    %495 = vector.broadcast %c3_i32_113 : i32 to vector<8x128xi32>
    %496 = arith.cmpi eq, %455, %495 : vector<8x128xi32>
    %497 = arith.select %496, %409, %414 : vector<8x128xi1>, vector<8x128xf32>
    %498 = arith.mulf %463, %494 : vector<8x128xf32>
    %499 = arith.subf %497, %498 : vector<8x128xf32>
    %c3_i32_114 = arith.constant 3 : i32
    %500 = vector.broadcast %c3_i32_114 : i32 to vector<8x128xi32>
    %501 = arith.cmpi eq, %455, %500 : vector<8x128xi32>
    %502 = arith.select %501, %431, %426 : vector<8x128xi1>, vector<8x128xf32>
    %503 = arith.mulf %502, %460 : vector<8x128xf32>
    %c3_i32_115 = arith.constant 3 : i32
    %504 = vector.broadcast %c3_i32_115 : i32 to vector<8x128xi32>
    %505 = arith.cmpi eq, %455, %504 : vector<8x128xi32>
    %506 = arith.select %505, %426, %431 : vector<8x128xi1>, vector<8x128xf32>
    %507 = arith.mulf %463, %503 : vector<8x128xf32>
    %508 = arith.subf %506, %507 : vector<8x128xf32>
    %c3_i32_116 = arith.constant 3 : i32
    %509 = vector.broadcast %c3_i32_116 : i32 to vector<8x128xi32>
    %510 = arith.cmpi eq, %455, %509 : vector<8x128xi32>
    %511 = arith.select %510, %448, %443 : vector<8x128xi1>, vector<8x128xf32>
    %512 = arith.mulf %511, %460 : vector<8x128xf32>
    %c3_i32_117 = arith.constant 3 : i32
    %513 = vector.broadcast %c3_i32_117 : i32 to vector<8x128xi32>
    %514 = arith.cmpi eq, %455, %513 : vector<8x128xi32>
    %515 = arith.select %514, %443, %448 : vector<8x128xi1>, vector<8x128xf32>
    %516 = arith.mulf %463, %512 : vector<8x128xf32>
    %517 = arith.subf %515, %516 : vector<8x128xf32>
    %518 = arith.mulf %472, %508 : vector<8x128xf32>
    %519 = arith.mulf %481, %499 : vector<8x128xf32>
    %520 = arith.subf %518, %519 : vector<8x128xf32>
    %521 = tpu.reciprocal %520 {approx = true} : vector<8x128xf32> -> vector<8x128xf32>
    %522 = arith.mulf %520, %521 : vector<8x128xf32>
    %cst_118 = arith.constant 2.000000e+00 : f32
    %523 = vector.broadcast %cst_118 : f32 to vector<8x128xf32>
    %524 = arith.subf %523, %522 : vector<8x128xf32>
    %525 = arith.mulf %521, %524 : vector<8x128xf32>
    %526 = arith.mulf %490, %508 : vector<8x128xf32>
    %527 = arith.mulf %481, %517 : vector<8x128xf32>
    %528 = arith.subf %526, %527 : vector<8x128xf32>
    %529 = arith.mulf %528, %525 : vector<8x128xf32>
    %530 = arith.mulf %472, %517 : vector<8x128xf32>
    %531 = arith.mulf %490, %499 : vector<8x128xf32>
    %532 = arith.subf %530, %531 : vector<8x128xf32>
    %533 = arith.mulf %532, %525 : vector<8x128xf32>
    %534 = arith.mulf %467, %529 : vector<8x128xf32>
    %535 = arith.subf %485, %534 : vector<8x128xf32>
    %536 = arith.mulf %476, %533 : vector<8x128xf32>
    %537 = arith.subf %535, %536 : vector<8x128xf32>
    %538 = arith.mulf %353, %529 : vector<8x128xf32>
    %539 = arith.subf %387, %538 : vector<8x128xf32>
    %540 = arith.mulf %370, %533 : vector<8x128xf32>
    %541 = arith.subf %539, %540 : vector<8x128xf32>
    %542 = arith.mulf %165, %529 : vector<8x128xf32>
    %543 = arith.subf %215, %542 : vector<8x128xf32>
    %544 = arith.mulf %190, %533 : vector<8x128xf32>
    %545 = arith.subf %543, %544 : vector<8x128xf32>
    %546 = arith.mulf %336, %537 : vector<8x128xf32>
    %547 = arith.subf %541, %546 : vector<8x128xf32>
    %548 = arith.mulf %115, %547 : vector<8x128xf32>
    %549 = arith.subf %545, %548 : vector<8x128xf32>
    %550 = arith.mulf %140, %537 : vector<8x128xf32>
    %551 = arith.subf %549, %550 : vector<8x128xf32>
    %552 = arith.mulf %494, %529 : vector<8x128xf32>
    %553 = arith.subf %512, %552 : vector<8x128xf32>
    %554 = arith.mulf %503, %533 : vector<8x128xf32>
    %555 = arith.subf %553, %554 : vector<8x128xf32>
    %556 = arith.mulf %404, %529 : vector<8x128xf32>
    %557 = arith.subf %438, %556 : vector<8x128xf32>
    %558 = arith.mulf %421, %533 : vector<8x128xf32>
    %559 = arith.subf %557, %558 : vector<8x128xf32>
    %560 = arith.mulf %240, %529 : vector<8x128xf32>
    %561 = arith.subf %290, %560 : vector<8x128xf32>
    %562 = arith.mulf %265, %533 : vector<8x128xf32>
    %563 = arith.subf %561, %562 : vector<8x128xf32>
    %564 = arith.mulf %336, %555 : vector<8x128xf32>
    %565 = arith.subf %559, %564 : vector<8x128xf32>
    %566 = arith.mulf %115, %565 : vector<8x128xf32>
    %567 = arith.subf %563, %566 : vector<8x128xf32>
    %568 = arith.mulf %140, %555 : vector<8x128xf32>
    %569 = arith.subf %567, %568 : vector<8x128xf32>
    %570 = vector.shape_cast %551 : vector<8x128xf32> to vector<1x8x128xf32>
    %571 = vector.shape_cast %547 : vector<8x128xf32> to vector<1x8x128xf32>
    %572 = vector.shape_cast %537 : vector<8x128xf32> to vector<1x8x128xf32>
    %573 = vector.shape_cast %569 : vector<8x128xf32> to vector<1x8x128xf32>
    %574 = vector.shape_cast %565 : vector<8x128xf32> to vector<1x8x128xf32>
    %575 = vector.shape_cast %555 : vector<8x128xf32> to vector<1x8x128xf32>
    %576 = vector.shape_cast %529 : vector<8x128xf32> to vector<1x8x128xf32>
    %577 = vector.shape_cast %533 : vector<8x128xf32> to vector<1x8x128xf32>
    %578 = vector.shape_cast %0 : vector<8x128xf32> to vector<1x8x128xf32>
    %579 = tpu.concatenate %570, %571, %572, %573, %574, %575, %576, %577, %578 in 0 : vector<1x8x128xf32>, vector<1x8x128xf32>, vector<1x8x128xf32>, vector<1x8x128xf32>, vector<1x8x128xf32>, vector<1x8x128xf32>, vector<1x8x128xf32>, vector<1x8x128xf32>, vector<1x8x128xf32> -> vector<9x8x128xf32>
    %580 = arith.index_cast %2 : i32 to index
    %c0_119 = arith.constant 0 : index
    %c0_120 = arith.constant 0 : index
    %c0_121 = arith.constant 0 : index
    %581 = vector.load %arg3[%580, %c0_119, %c0_120, %c0_121] : memref<1x9x8x128xf32, #tpu.memory_space<vmem>>, vector<1x9x8x128xf32>
    %582 = vector.shape_cast %581 : vector<1x9x8x128xf32> to vector<9x8x128xf32>
    %583 = vector.shape_cast %579 : vector<9x8x128xf32> to vector<1x9x8x128xf32>
    tpu.vector_store %arg3[%580, %c0_119, %c0_120, %c0_121], %583 {strides = array<i32>} : memref<1x9x8x128xf32, #tpu.memory_space<vmem>>, vector<1x9x8x128xf32>,
    %c1_i32_122 = arith.constant 1 : i32
    return
  }
  func.func @transform_0(%arg0: i32) -> (i32, i32, i32, i32) {
    %c0_i32 = arith.constant 0 : i32
    %c0_i32_0 = arith.constant 0 : i32
    %c0_i32_1 = arith.constant 0 : i32
    %c0_i32_2 = arith.constant 0 : i32
    return %arg0, %c0_i32, %c0_i32_0, %c0_i32_1 : i32, i32, i32, i32
  }
  func.func @transform_1(%arg0: i32) -> (i32, i32, i32, i32) {
    %c0_i32 = arith.constant 0 : i32
    %c0_i32_0 = arith.constant 0 : i32
    %c0_i32_1 = arith.constant 0 : i32
    %c0_i32_2 = arith.constant 0 : i32
    return %arg0, %c0_i32, %c0_i32_0, %c0_i32_1 : i32, i32, i32, i32
  }
  func.func @transform_2(%arg0: i32) -> (i32, i32, i32, i32) {
    %c0_i32 = arith.constant 0 : i32
    %c0_i32_0 = arith.constant 0 : i32
    %c0_i32_1 = arith.constant 0 : i32
    %c0_i32_2 = arith.constant 0 : i32
    return %arg0, %c0_i32, %c0_i32_0, %c0_i32_1 : i32, i32, i32, i32
  }
}

</mosaic_0001>

<bundles_post_ra>
// kernel: tpu_custom_call.1
= control target key start
LH: loop header
LB: loop body
LE: loop exit
PB: predicated region body
PF: predicated region fallthrough
CT: control target
= control target key end

     0   :  { %7 = vsyncpa [#allocation3], 0  ;;  %s1041_s0 = inlined_call_operand.hbm [shape: f32[1,8,8,128], index: 0, kind: input, shape index: {}]   ;;  %s1042_s1 = inlined_call_operand.hbm [shape: f32[1,8,8,128], index: 1, kind: input, shape index: {}]   ;;  %s1043_s2 = inlined_call_operand.hbm [shape: f32[1,9,8,128], index: 2, kind: output, shape index: {}]  }
   0x1   :  { %8 = vsyncpa [#allocation6], 0 }
   0x2   :  { %9 = vsyncpa [#allocation4], 0  ;;  %s490_s9 = smov [#allocation2]   ;;  %s418_s13 = scalar_lea.hbm %s1041_s0, 1024 }
   0x3   :  { %s15_s10 = sshll.u32 %s490_s9, 4  ;;  %p419_p0 = scmp.ne.s32.totalorder %s1041_s0, %s418_s13  ;;  %s16_s10 = int_to_ptr.vmem [resolvable:$true] %s15_s10 }
   0x4   :  { %p422_p1 = scmp.lt.u32.totalorder %s418_s13, %s1041_s0 }
   0x6   :  { %p424_p2 = pnand %p422_p1, %p419_p0 }
   0x8   :  { %427 = shalt.err (!%p424_p2)
}
   0x9   :  { %s428_s18 = scalar_lea.vmem %s16_s10, 1024  ;;  %p433_p4 = scmp.lt.s32.totalorder %s16_s10, %s16_s10 }
   0xa   :  { %p429_p3 = scmp.ne.s32.totalorder %s16_s10, %s428_s18  ;;  %p434_p5 = scmp.lt.s32.totalorder %s428_s18, %s428_s18 }
   0xc   :  { %p435_p6 = por %p434_p5, %p433_p4 }
   0xe   :  { %p436_p7 = pnand %p435_p6, %p429_p3 }
  0x10   :  { %439 = shalt.err (!%p436_p7)
}
  0x11   :  { %s491_s19 = smov 128   ;;  %s492_s20 = smov 8  }
  0x12   :  { %21 = dma.hbm_to_vmem [thread:$0]  %s1041_s0, 1024, %s16_s10, [#allocation3], %s491_s19, %s491_s19, %s492_s20  }
  0x13   :  { %s493_s23 = smov [#allocation5]   ;;  %s440_s27 = scalar_lea.hbm %s1042_s1, 1024 }
  0x14   :  { %s27_s24 = sshll.u32 %s493_s23, 4  ;;  %p441_p8 = scmp.ne.s32.totalorder %s1042_s1, %s440_s27  ;;  %s28_s24 = int_to_ptr.vmem [resolvable:$true] %s27_s24 }
  0x15   :  { %p444_p9 = scmp.lt.u32.totalorder %s440_s27, %s1042_s1 }
  0x17   :  { %p446_p10 = pnand %p444_p9, %p441_p8 }
  0x19   :  { %449 = shalt.err (!%p446_p10)
}
  0x1a   :  { %s450_s4 = scalar_lea.vmem %s28_s24, 1024  ;;  %p455_p12 = scmp.lt.s32.totalorder %s28_s24, %s28_s24 }
  0x1b   :  { %p451_p11 = scmp.ne.s32.totalorder %s28_s24, %s450_s4  ;;  %p456_p13 = scmp.lt.s32.totalorder %s450_s4, %s450_s4 }
  0x1d   :  { %p457_p0 = por %p456_p13, %p455_p12 }
  0x1f   :  { %p458_p1 = pnand %p457_p0, %p451_p11 }
  0x21   :  { %461 = shalt.err (!%p458_p1)
}
  0x22   :  { %33 = dma.hbm_to_vmem [thread:$0]  %s1042_s1, 1024, %s28_s24, [#allocation6], %s491_s19, %s491_s19, %s492_s20  }
  0x23   :  { %484 = dma.done.wait [#allocation3], 1024  }
  0x24   :  { %485 = vsyncadd [#allocation3], 4294966272 }
  0x25   :  { %486 = dma.done.wait [#allocation6], 1024  }
  0x26   :  { %487 = vsyncadd [#allocation6], 4294966272  ;;  %v543_v0 = vld [vmem:[#allocation2] sm:$0xff]  ;;  %v545_v1 = vld [vmem:[#allocation2 + $0x10] sm:$0xff]  ;;  %v494_v10 = vmov 0   ;;  %v495_v16 = vmov 1.0  }
  0x27   :  { %v547_v2 = vld [vmem:[#allocation2 + $0x20] sm:$0xff]  ;;  %v549_v3 = vld [vmem:[#allocation2 + $0x30] sm:$0xff]  ;;  %v80_v4 = vand.u32 2147483647, %v543_v0  ;;  %v81_v5 = vand.u32 2147483647, %v545_v1 }
  0x28   :  { %v86_v6 = vand.u32 2147483647, %v547_v2  ;;  %v91_v7 = vand.u32 2147483647, %v549_v3  ;;  %383 = vst [vmem:[#allocation7 + $0x40] sm:$0xff] %v495_v16  ;;  %v41_v18 = vld [vmem:[#allocation2 + $0x8] sm:$0xff] }
  0x29   :  { %vm82_vm0 = vcmp.gt.f32.partialorder %v81_v5, %v80_v4  ;;  %v43_v19 = vld [vmem:[#allocation2 + $0x18] sm:$0xff]  ;;  %v45_v20 = vld [vmem:[#allocation2 + $0x28] sm:$0xff]  ;;  %v56_v39 = vsub.f32 0.0, %v543_v0  ;;  %v62_v40 = vsub.f32 0.0, %v545_v1  ;;  %v612_v42 = vld [vmem:[#allocation5] sm:$0xff]  ;;  %v57_v45 = vsub.f32 0.0, %v41_v18 }
  0x2a   :  { %v83_v8 = vsel %vm82_vm0, %v81_v5, %v80_v4  ;;  %v84_v9 = vsel %vm82_vm0, %v545_v1, %v543_v0  ;;  %v85_v11 = vsel %vm82_vm0, 1, %v494_v10  ;;  %v565_v23 = vld [vmem:[#allocation2 + $0x38] sm:$0xff]  ;;  %v50_v43 = vld [vmem:[#allocation5 + $0x10] sm:$0xff]  ;;  %v63_v46 = vsub.f32 0.0, %v43_v19  ;;  %v52_v50 = vld [vmem:[#allocation5 + $0x20] sm:$0xff]  ;;  %s497_s1 = smov [#allocation7]  }
  0x2b   :  { %vm87_vm1 = vcmp.gt.f32.partialorder %v86_v6, %v83_v8  ;;  %v68_v47 = vsub.f32 0.0, %v547_v2  ;;  %v58_v51 = vmul.f32 %v56_v39, %v612_v42  ;;  %v64_v52 = vmul.f32 %v62_v40, %v50_v43  ;;  %v623_v54 = vld [vmem:[#allocation5 + $0x8] sm:$0xff]  ;;  %v629_v57 = vld [vmem:[#allocation5 + $0x18] sm:$0xff]  ;;  %v54_v62 = vld [vmem:[#allocation5 + $0x30] sm:$0xff]  ;;  %s389_s6 = sshll.u32 %s497_s1, 4  ;;  %s390_s6 = int_to_ptr.vmem [resolvable:$true] %s389_s6 }
  0x2c   :  { %v88_v12 = vsel %vm87_vm1, %v86_v6, %v83_v8  ;;  %v89_v13 = vsel %vm87_vm1, %v547_v2, %v84_v9  ;;  %v90_v14 = vsel %vm87_vm1, 2, %v85_v11  ;;  %v69_v55 = vsub.f32 0.0, %v45_v20  ;;  %v633_v61 = vld [vmem:[#allocation5 + $0x28] sm:$0xff]  ;;  %v646_v6 = vld [vmem:[#allocation5 + $0x38] sm:$0xff]  ;;  %s462_s7 = scalar_lea.vmem %s390_s6, 1152  ;;  %p467_p3 = scmp.lt.s32.totalorder %s390_s6, %s390_s6 }
  0x2d   :  { %vm92_vm2 = vcmp.gt.f32.partialorder %v91_v7, %v88_v12  ;;  %v59_v58 = vmul.f32 %v57_v45, %v612_v42  ;;  %v65_v59 = vmul.f32 %v63_v46, %v50_v43  ;;  %v74_v60 = vsub.f32 0.0, %v549_v3  ;;  %p463_p2 = scmp.ne.s32.totalorder %s390_s6, %s462_s7  ;;  %p468_p4 = scmp.lt.s32.totalorder %s462_s7, %s462_s7 }
  0x2e   :  { %v93_v15 = vsel %vm92_vm2, %v549_v3, %v89_v13  ;;  %v559_v17 = vsel %vm92_vm2, 3, %v90_v14  ;;  %v70_v63 = vmul.f32 %v68_v47, %v52_v50  ;;  %v61_v7 = vmul.f32 %v57_v45, %v623_v54 }
  0x2f   :  { %410 = vrcp.f32 %v93_v15  ;;  %vm99_vm3 = vcmp.eq.s32.totalorder %v559_v17, 1  ;;  %vm101_vm4 = vcmp.eq.s32.totalorder %v559_v17, 2  ;;  %vm103_vm5 = vcmp.eq.s32.totalorder %v559_v17, 3  ;;  %p469_p5 = por %p468_p4, %p467_p3 }
  0x30   :  { %v105_v21 = vsel %vm99_vm3, %v43_v19, %v41_v18  ;;  %v579_v29 = vsel %vm99_vm3, %v543_v0, %v545_v1  ;;  %v585_v30 = vsel %vm101_vm4, %v543_v0, %v547_v2  ;;  %v109_v34 = vsel %vm99_vm3, %v41_v18, %v43_v19 }
  0x31   :  { %v106_v25 = vsel %vm101_vm4, %v45_v20, %v105_v21  ;;  %v112_v35 = vsel %vm101_vm4, %v41_v18, %v45_v20  ;;  %v602_v36 = vsel %vm103_vm5, %v543_v0, %v549_v3  ;;  %v115_v44 = vsel %vm103_vm5, %v41_v18, %v565_v23  ;;  %p470_p6 = pnand %p469_p5, %p463_p2 }
  0x32   :  { %v107_v27 = vsel %vm103_vm5, %v565_v23, %v106_v25  ;;  %v75_v0 = vsub.f32 0.0, %v565_v23  ;;  %v60_v2 = vmul.f32 %v56_v39, %v623_v54  ;;  %v124_v4 = vsel %vm99_vm3, %v64_v52, %v58_v51 }
  0x33   :  { %v66_v8 = vmul.f32 %v62_v40, %v629_v57  ;;  %v67_v9 = vmul.f32 %v63_v46, %v629_v57  ;;  %v71_v10 = vmul.f32 %v69_v55, %v52_v50  ;;  %v72_v11 = vmul.f32 %v68_v47, %v633_v61 }
  0x34   :  { %v76_v12 = vmul.f32 %v74_v60, %v54_v62  ;;  %v137_v13 = vsel %vm99_vm3, %v65_v59, %v59_v58  ;;  %v77_v16 = vmul.f32 %v75_v0, %v54_v62  ;;  %v125_v18 = vsel %vm101_vm4, %v70_v63, %v124_v4 }
  0x35   :  { %v78_v20 = vmul.f32 %v74_v60, %v646_v6  ;;  %v79_v21 = vmul.f32 %v75_v0, %v646_v6  ;;  %v131_v23 = vsel %vm101_vm4, %v58_v51, %v70_v63  ;;  %v138_v25 = vsel %vm101_vm4, %v71_v10, %v137_v13 }
  0x36   :  { %v139_v45 = vsel %vm103_vm5, %v77_v16, %v138_v25  ;;  %v710_v47 = vsel %vm99_vm3, %v612_v42, %v50_v43  ;;  %v199_v25 = vsel %vm103_vm5, %v623_v54, %v646_v6 }
  0x37   :  { %v173_v4 = vsel %vm103_vm5, %v60_v2, %v78_v20 }
  0x39   :  { %v411_v22 = vpop.eup %410 }
  0x3a   :  { %v96_v24 = vmul.f32 %v411_v22, %v93_v15  ;;  %v73_v15 = vmul.f32 %v69_v55, %v633_v61 }
  0x3c   :  { %v97_v26 = vsub.f32 2.0, %v96_v24  ;;  %v672_v24 = vsel %vm103_vm5, %v58_v51, %v76_v12 }
  0x3e   :  { %v573_v28 = vmul.f32 %v411_v22, %v97_v26  ;;  %v128_v22 = vsel %vm99_vm3, %v58_v51, %v64_v52  ;;  %v150_v26 = vsel %vm99_vm3, %v50_v43, %v612_v42  ;;  %v722_v51 = vsel %vm103_vm5, %v612_v42, %v54_v62 }
  0x3f   :  { %v151_v46 = vsel %vm101_vm4, %v52_v50, %v150_v26 }
  0x40   :  { %v588_v31 = vmul.f32 %v107_v27, %v573_v28  ;;  %v126_v27 = vsel %vm103_vm5, %v76_v12, %v125_v18  ;;  %v118_v39 = vmul.f32 %v579_v29, %v573_v28  ;;  %v693_v40 = vmul.f32 %v585_v30, %v573_v28 }
  0x41   :  { %v122_v55 = vmul.f32 %v602_v36, %v573_v28  ;;  %v733_v56 = vmul.f32 %v126_v27, %v573_v28  ;;  %v152_v60 = vsel %vm103_vm5, %v54_v62, %v151_v46  ;;  %v183_v62 = vsel %vm101_vm4, %v61_v7, %v73_v15 }
  0x42   :  { %v110_v32 = vmul.f32 %v588_v31, %v579_v29  ;;  %v113_v33 = vmul.f32 %v588_v31, %v585_v30  ;;  %v116_v41 = vmul.f32 %v588_v31, %v602_v36  ;;  %v769_v13 = vmul.f32 %v139_v45, %v573_v28 }
  0x43   :  { %v132_v12 = vmul.f32 %v733_v56, %v585_v30  ;;  %v193_v18 = vsel %vm99_vm3, %v623_v54, %v629_v57 }
  0x44   :  { %v604_v37 = vsub.f32 %v109_v34, %v110_v32  ;;  %v606_v38 = vsub.f32 %v112_v35, %v113_v33  ;;  %v621_v53 = vsub.f32 %v115_v44, %v116_v41  ;;  %v683_v32 = vsel %vm99_vm3, %v59_v58, %v65_v59 }
  0x45   :  { %v163_v33 = vsel %vm99_vm3, %v66_v8, %v60_v2  ;;  %v496_v34 = vmov 1   ;;  %v697_v41 = vsel %vm101_vm4, %v59_v58, %v71_v10  ;;  %v701_v44 = vsel %vm103_vm5, %v59_v58, %v77_v16 }
  0x46   :  { %v202_v48 = vand.u32 2147483647, %v604_v37  ;;  %v203_v49 = vand.u32 2147483647, %v606_v38  ;;  %v208_v3 = vand.u32 2147483647, %v621_v53  ;;  %v164_v52 = vsel %vm101_vm4, %v72_v11, %v163_v33 }
  0x47   :  { %v119_v58 = vsub.f32 1.0, %v118_v39  ;;  %v121_v59 = vsub.f32 1.0, %v693_v40  ;;  %v165_v0 = vsel %vm103_vm5, %v78_v20, %v164_v52  ;;  %v789_v20 = vmul.f32 %v152_v60, %v573_v28 }
  0x48   :  { %vm625_vm6 = vcmp.gt.f32.partialorder %v203_v49, %v202_v48  ;;  %v135_v33 = vmul.f32 %v733_v56, %v602_v36  ;;  %v148_v17 = vmul.f32 %v769_v13, %v602_v36 }
  0x49   :  { %v205_v1 = vsel %vm625_vm6, %v203_v49, %v202_v48  ;;  %v206_v5 = vsel %vm625_vm6, %v606_v38, %v604_v37  ;;  %v207_v35 = vsel %vm625_vm6, 2, %v496_v34  ;;  %v176_v48 = vsel %vm99_vm3, %v67_v9, %v61_v7 }
  0x4a   :  { %vm654_vm7 = vcmp.gt.f32.partialorder %v208_v3, %v205_v1  ;;  %v717_v49 = vsel %vm101_vm4, %v612_v42, %v52_v50  ;;  %v167_v50 = vsel %vm99_vm3, %v60_v2, %v66_v8  ;;  %v189_v42 = vsel %vm99_vm3, %v629_v57, %v623_v54 }
  0x4b   :  { %v210_v19 = vsel %vm654_vm7, %v621_v53, %v206_v5  ;;  %v728_v43 = vsel %vm654_vm7, 3, %v207_v35  ;;  %v177_v63 = vsel %vm101_vm4, %v73_v15, %v176_v48  ;;  %v170_v1 = vsel %vm101_vm4, %v60_v2, %v72_v11 }
  0x4c   :  { %412 = vrcp.f32 %v210_v19  ;;  %vm216_vm8 = vcmp.eq.s32.totalorder %v728_v43, 2  ;;  %v180_v5 = vsel %vm99_vm3, %v61_v7, %v67_v9  ;;  %v186_v3 = vsel %vm103_vm5, %v61_v7, %v79_v21 }
  0x4d   :  { %v190_v8 = vsel %vm101_vm4, %v633_v61, %v189_v42  ;;  %v123_v11 = vsub.f32 1.0, %v122_v55  ;;  %v129_v2 = vmul.f32 %v733_v56, %v579_v29  ;;  %v178_v9 = vsel %vm103_vm5, %v79_v21, %v177_v63 }
  0x4e   :  { %vm218_vm9 = vcmp.eq.s32.totalorder %v728_v43, 3  ;;  %v220_v7 = vsel %vm216_vm8, %v121_v59, %v119_v58  ;;  %v775_v15 = vmul.f32 %v165_v0, %v573_v28  ;;  %v191_v16 = vsel %vm103_vm5, %v646_v6, %v190_v8 }
  0x4f   :  { %v792_v21 = vmul.f32 %v178_v9, %v573_v28  ;;  %v798_v27 = vsub.f32 %v128_v22, %v129_v2  ;;  %v800_v57 = vsub.f32 %v131_v23, %v132_v12  ;;  %v142_v34 = vmul.f32 %v769_v13, %v579_v29 }
  0x50   :  { %v145_v35 = vmul.f32 %v769_v13, %v585_v30  ;;  %v168_v6 = vmul.f32 %v775_v15, %v579_v29  ;;  %v171_v22 = vmul.f32 %v775_v15, %v585_v30  ;;  %v822_v23 = vsel %vm216_vm8, %v604_v37, %v606_v38 }
  0x51   :  { %v828_v39 = vsel %vm218_vm9, %v604_v37, %v621_v53  ;;  %v155_v40 = vmul.f32 %v789_v20, %v579_v29  ;;  %v181_v45 = vmul.f32 %v792_v21, %v579_v29  ;;  %v184_v46 = vmul.f32 %v792_v21, %v585_v30 }
  0x52   :  { %v158_v38 = vmul.f32 %v789_v20, %v585_v30  ;;  %v842_v52 = vmul.f32 %v191_v16, %v573_v28  ;;  %v223_v37 = vsel %vm216_vm8, %v119_v58, %v121_v59  ;;  %v226_v53 = vsel %vm218_vm9, %v119_v58, %v123_v11 }
  0x53   :  { %v174_v55 = vmul.f32 %v775_v15, %v602_v36  ;;  %v187_v42 = vmul.f32 %v792_v21, %v602_v36  ;;  %v143_v0 = vsub.f32 %v683_v32, %v142_v34  ;;  %v146_v8 = vsub.f32 %v697_v41, %v145_v35 }
  0x54   :  { %v169_v59 = vsub.f32 %v167_v50, %v168_v6  ;;  %v182_v2 = vsub.f32 %v180_v5, %v181_v45  ;;  %v185_v58 = vsub.f32 %v183_v62, %v184_v46  ;;  %v136_v9 = vsub.f32 %v672_v24, %v135_v33 }
  0x55   :  { %v197_v32 = vmul.f32 %v842_v52, %v585_v30  ;;  %v149_v41 = vsub.f32 %v701_v44, %v148_v17  ;;  %v175_v50 = vsub.f32 %v173_v4, %v174_v55  ;;  %v229_v5 = vsel %vm216_vm8, %v800_v57, %v798_v27 }
  0x56   :  { %v413_v10 = vpop.eup %412  ;;  %v238_v24 = vsel %vm216_vm8, %v146_v8, %v143_v0  ;;  %v156_v30 = vsub.f32 %v710_v47, %v155_v40  ;;  %v159_v44 = vsub.f32 %v717_v49, %v158_v38  ;;  %v200_v4 = vmul.f32 %v842_v52, %v602_v36 }
  0x57   :  { %v213_v14 = vmul.f32 %v413_v10, %v210_v19  ;;  %v196_v19 = vsel %vm101_vm4, %v623_v54, %v633_v61  ;;  %v221_v61 = vsel %vm218_vm9, %v123_v11, %v220_v7  ;;  %v194_v7 = vmul.f32 %v842_v52, %v579_v29 }
  0x58   :  { %v198_v33 = vsub.f32 %v196_v19, %v197_v32  ;;  %v239_v47 = vsel %vm218_vm9, %v149_v41, %v238_v24  ;;  %v201_v35 = vsub.f32 %v199_v25, %v200_v4  ;;  %v235_v25 = vsel %vm218_vm9, %v798_v27, %v136_v9 }
  0x59   :  { %v214_v26 = vsub.f32 2.0, %v213_v14  ;;  %v161_v14 = vmul.f32 %v789_v20, %v602_v36  ;;  %v241_v38 = vsel %vm216_vm8, %v143_v0, %v146_v8 }
  0x5b   :  { %v812_v54 = vmul.f32 %v413_v10, %v214_v26  ;;  %v172_v10 = vsub.f32 %v170_v1, %v171_v22  ;;  %v188_v1 = vsub.f32 %v186_v3, %v187_v42  ;;  %v265_v3 = vsel %vm216_vm8, %v185_v58, %v182_v2 }
  0x5c   :  { %v195_v26 = vsub.f32 %v193_v18, %v194_v7  ;;  %v162_v19 = vsub.f32 %v722_v51, %v161_v14  ;;  %v247_v22 = vsel %vm216_vm8, %v159_v44, %v156_v30  ;;  %v232_v51 = vsel %vm216_vm8, %v798_v27, %v800_v57 }
  0x5d   :  { %v837_v48 = vmul.f32 %v221_v61, %v812_v54  ;;  %v256_v62 = vsel %vm216_vm8, %v172_v10, %v169_v59  ;;  %v230_v61 = vsel %vm218_vm9, %v136_v9, %v229_v5  ;;  %v266_v18 = vsel %vm218_vm9, %v188_v1, %v265_v3 }
  0x5e   :  { %v257_v49 = vsel %vm218_vm9, %v175_v50, %v256_v62  ;;  %v904_v17 = vmul.f32 %v230_v61, %v812_v54  ;;  %v907_v6 = vmul.f32 %v239_v47, %v812_v54  ;;  %v274_v45 = vsel %vm216_vm8, %v198_v33, %v195_v26 }
  0x5f   :  { %v224_v60 = vmul.f32 %v837_v48, %v822_v23  ;;  %v227_v63 = vmul.f32 %v837_v48, %v828_v39  ;;  %v912_v40 = vmul.f32 %v257_v49, %v812_v54  ;;  %v917_v46 = vmul.f32 %v266_v18, %v812_v54 }
  0x60   :  { %v236_v55 = vmul.f32 %v904_v17, %v828_v39  ;;  %v248_v42 = vsel %vm218_vm9, %v162_v19, %v247_v22  ;;  %v275_v57 = vsel %vm218_vm9, %v201_v35, %v274_v45  ;;  %v242_v27 = vmul.f32 %v907_v6, %v822_v23 }
  0x61   :  { %v858_v11 = vsub.f32 %v223_v37, %v224_v60  ;;  %v860_v12 = vsub.f32 %v226_v53, %v227_v63  ;;  %v244_v37 = vsel %vm218_vm9, %v143_v0, %v149_v41  ;;  %v233_v53 = vmul.f32 %v904_v17, %v822_v23 }
  0x62   :  { %v245_v60 = vmul.f32 %v907_v6, %v828_v39  ;;  %v260_v63 = vmul.f32 %v912_v40, %v822_v23  ;;  %v263_v0 = vmul.f32 %v912_v40, %v828_v39  ;;  %v259_v8 = vsel %vm216_vm8, %v169_v59, %v172_v10 }
  0x63   :  { %v283_v29 = vand.u32 2147483647, %v858_v11  ;;  %v284_v16 = vand.u32 2147483647, %v860_v12  ;;  %v262_v9 = vsel %vm218_vm9, %v169_v59, %v175_v50  ;;  %v269_v14 = vmul.f32 %v917_v46, %v822_v23 }
  0x64   :  { %v272_v7 = vmul.f32 %v917_v46, %v828_v39  ;;  %v955_v32 = vmul.f32 %v248_v42, %v812_v54  ;;  %v268_v41 = vsel %vm216_vm8, %v182_v2, %v185_v58  ;;  %v271_v5 = vsel %vm218_vm9, %v182_v2, %v188_v1 }
  0x65   :  { %vm888_vm10 = vcmp.gt.f32.partialorder %v284_v16, %v283_v29  ;;  %v962_v10 = vmul.f32 %v275_v57, %v812_v54  ;;  %v234_v24 = vsub.f32 %v232_v51, %v233_v53  ;;  %v237_v59 = vsub.f32 %v235_v25, %v236_v55 }
  0x66   :  { %v286_v36 = vsel %vm888_vm10, %v860_v12, %v858_v11  ;;  %v243_v62 = vsub.f32 %v241_v38, %v242_v27  ;;  %v246_v29 = vsub.f32 %v244_v37, %v245_v60  ;;  %v261_v16 = vsub.f32 %v259_v8, %v260_v63 }
  0x67   :  { %414 = vrcp.f32 %v286_v36  ;;  %v264_v4 = vsub.f32 %v262_v9, %v263_v0  ;;  %v270_v3 = vsub.f32 %v268_v41, %v269_v14  ;;  %v273_v61 = vsub.f32 %v271_v5, %v272_v7 }
  0x68   :  { %v250_v49 = vsel %vm216_vm8, %v156_v30, %v159_v44  ;;  %v251_v58 = vmul.f32 %v955_v32, %v822_v23  ;;  %v254_v54 = vmul.f32 %v955_v32, %v828_v39  ;;  %v278_v2 = vmul.f32 %v962_v10, %v822_v23 }
  0x69   :  { %v253_v1 = vsel %vm218_vm9, %v156_v30, %v162_v19  ;;  %v277_v18 = vsel %vm216_vm8, %v195_v26, %v198_v33  ;;  %v280_v44 = vsel %vm218_vm9, %v195_v26, %v201_v35  ;;  %v294_v45 = vsel %vm888_vm10, %v237_v59, %v234_v24 }
  0x6a   :  { %v299_v51 = vsel %vm888_vm10, %v246_v29, %v243_v62  ;;  %v309_v23 = vsel %vm888_vm10, %v264_v4, %v261_v16  ;;  %v314_v33 = vsel %vm888_vm10, %v273_v61, %v270_v3  ;;  %v252_v19 = vsub.f32 %v250_v49, %v251_v58 }
  0x6b   :  { %v255_v25 = vsub.f32 %v253_v1, %v254_v54  ;;  %v293_v43 = vsel %vm888_vm10, %v858_v11, %v860_v12  ;;  %v296_v53 = vsel %vm888_vm10, %v234_v24, %v237_v59  ;;  %v301_v55 = vsel %vm888_vm10, %v243_v62, %v246_v29 }
  0x6c   :  { %v311_v42 = vsel %vm888_vm10, %v261_v16, %v264_v4  ;;  %v316_v11 = vsel %vm888_vm10, %v270_v3, %v273_v61 }
  0x6d   :  { %v304_v14 = vsel %vm888_vm10, %v255_v25, %v252_v19  ;;  %v306_v4 = vsel %vm888_vm10, %v252_v19, %v255_v25 }
  0x71   :  { %v415_v50 = vpop.eup %414 }
  0x72   :  { %v289_v47 = vmul.f32 %v415_v50, %v286_v36  ;;  %v281_v36 = vmul.f32 %v962_v10, %v828_v39  ;;  %v279_v39 = vsub.f32 %v277_v18, %v278_v2 }
  0x74   :  { %v290_v22 = vsub.f32 2.0, %v289_v47  ;;  %v282_v26 = vsub.f32 %v280_v44, %v281_v36 }
  0x76   :  { %v291_v30 = vmul.f32 %v415_v50, %v290_v22  ;;  %v319_v41 = vsel %vm888_vm10, %v282_v26, %v279_v39  ;;  %v321_v3 = vsel %vm888_vm10, %v279_v39, %v282_v26 }
  0x78   :  { %v295_v35 = vmul.f32 %v294_v45, %v291_v30  ;;  %v300_v38 = vmul.f32 %v299_v51, %v291_v30  ;;  %v310_v37 = vmul.f32 %v309_v23, %v291_v30  ;;  %v315_v57 = vmul.f32 %v314_v33, %v291_v30 }
  0x79   :  { %v305_v59 = vmul.f32 %v304_v14, %v291_v30  ;;  %v320_v50 = vmul.f32 %v319_v41, %v291_v30 }
  0x7a   :  { %v297_v27 = vmul.f32 %v295_v35, %v293_v43  ;;  %v302_v60 = vmul.f32 %v300_v38, %v293_v43  ;;  %v312_v63 = vmul.f32 %v310_v37, %v293_v43  ;;  %v317_v12 = vmul.f32 %v315_v57, %v293_v43 }
  0x7b   :  { %v307_v29 = vmul.f32 %v305_v59, %v293_v43  ;;  %v322_v16 = vmul.f32 %v320_v50, %v293_v43 }
  0x7c   :  { %v298_v0 = vsub.f32 %v296_v53, %v297_v27  ;;  %v303_v8 = vsub.f32 %v301_v55, %v302_v60  ;;  %v313_v9 = vsub.f32 %v311_v42, %v312_v63  ;;  %v318_v7 = vsub.f32 %v316_v11, %v317_v12 }
  0x7d   :  { %v308_v61 = vsub.f32 %v306_v4, %v307_v29  ;;  %v323_v47 = vsub.f32 %v321_v3, %v322_v16 }
  0x7e   :  { %v325_v5 = vmul.f32 %v313_v9, %v303_v8  ;;  %v324_v24 = vmul.f32 %v318_v7, %v298_v0 }
  0x7f   :  { %v331_v49 = vmul.f32 %v318_v7, %v308_v61  ;;  %v332_v58 = vmul.f32 %v323_v47, %v303_v8  ;;  %v335_v54 = vmul.f32 %v323_v47, %v298_v0  ;;  %v336_v2 = vmul.f32 %v313_v9, %v308_v61 }
  0x80   :  { %v326_v62 = vsub.f32 %v324_v24, %v325_v5 }
  0x81   :  { %v333_v22 = vsub.f32 %v331_v49, %v332_v58  ;;  %v337_v44 = vsub.f32 %v335_v54, %v336_v2 }
  0x82   :  { %416 = vrcp.f32 %v326_v62 }
  0x8c   :  { %v417_v1 = vpop.eup %416 }
  0x8d   :  { %v328_v18 = vmul.f32 %v417_v1, %v326_v62 }
  0x8f   :  { %v329_v36 = vsub.f32 2.0, %v328_v18 }
  0x91   :  { %v330_v45 = vmul.f32 %v417_v1, %v329_v36 }
  0x93   :  { %v334_v51 = vmul.f32 %v333_v22, %v330_v45  ;;  %v338_v23 = vmul.f32 %v337_v44, %v330_v45 }
  0x95   :  { %v339_v30 = vmul.f32 %v334_v51, %v295_v35  ;;  %v341_v33 = vmul.f32 %v338_v23, %v300_v38  ;;  %v343_v19 = vmul.f32 %v334_v51, %v904_v17  ;;  %v345_v34 = vmul.f32 %v338_v23, %v907_v6  ;;  %381 = vst [vmem:[#allocation7 + $0x30] sm:$0xff] %v334_v51 }
  0x96   :  { %382 = vst [vmem:[#allocation7 + $0x38] sm:$0xff] %v338_v23  ;;  %v347_v25 = vmul.f32 %v334_v51, %v733_v56  ;;  %v357_v39 = vmul.f32 %v334_v51, %v310_v37  ;;  %v359_v43 = vmul.f32 %v338_v23, %v315_v57  ;;  %v361_v55 = vmul.f32 %v334_v51, %v912_v40 }
  0x97   :  { %v340_v26 = vsub.f32 %v305_v59, %v339_v30  ;;  %v344_v53 = vsub.f32 %v955_v32, %v343_v19  ;;  %v363_v42 = vmul.f32 %v338_v23, %v917_v46  ;;  %v349_v35 = vmul.f32 %v338_v23, %v769_v13 }
  0x98   :  { %v358_v38 = vsub.f32 %v320_v50, %v357_v39  ;;  %v365_v17 = vmul.f32 %v334_v51, %v775_v15  ;;  %v348_v60 = vsub.f32 %v789_v20, %v347_v25  ;;  %v362_v56 = vsub.f32 %v962_v10, %v361_v55 }
  0x99   :  { %v342_v27 = vsub.f32 %v340_v26, %v341_v33  ;;  %v346_v6 = vsub.f32 %v344_v53, %v345_v34  ;;  %v367_v32 = vmul.f32 %v338_v23, %v792_v21 }
  0x9a   :  { %v360_v37 = vsub.f32 %v358_v38, %v359_v43  ;;  %v366_v57 = vsub.f32 %v842_v52, %v365_v17  ;;  %v364_v46 = vsub.f32 %v362_v56, %v363_v42  ;;  %v350_v63 = vsub.f32 %v348_v60, %v349_v35 }
  0x9b   :  { %v351_v40 = vmul.f32 %v342_v27, %v837_v48  ;;  %377 = vst [vmem:[#allocation7 + $0x10] sm:$0xff] %v342_v27  ;;  %v355_v10 = vmul.f32 %v342_v27, %v573_v28 }
  0x9c   :  { %v369_v13 = vmul.f32 %v360_v37, %v837_v48  ;;  %380 = vst [vmem:[#allocation7 + $0x28] sm:$0xff] %v360_v37  ;;  %v368_v11 = vsub.f32 %v366_v57, %v367_v32  ;;  %v373_v21 = vmul.f32 %v360_v37, %v573_v28 }
  0x9d   :  { %v352_v15 = vsub.f32 %v346_v6, %v351_v40 }
  0x9e   :  { %v370_v12 = vsub.f32 %v364_v46, %v369_v13 }
  0x9f   :  { %v353_v20 = vmul.f32 %v352_v15, %v588_v31  ;;  %376 = vst [vmem:[#allocation7 + $0x8] sm:$0xff] %v352_v15 }
  0xa0   :  { %v371_v52 = vmul.f32 %v370_v12, %v588_v31  ;;  %379 = vst [vmem:[#allocation7 + $0x20] sm:$0xff] %v370_v12 }
  0xa1   :  { %v354_v0 = vsub.f32 %v350_v63, %v353_v20 }
  0xa2   :  { %v372_v8 = vsub.f32 %v368_v11, %v371_v52 }
  0xa3   :  { %v356_v48 = vsub.f32 %v354_v0, %v355_v10 }
  0xa4   :  { %v374_v9 = vsub.f32 %v372_v8, %v373_v21 }
  0xa5   :  { %375 = vst [vmem:[#allocation7] sm:$0xff] %v356_v48 }
  0xa6   :  { %378 = vst [vmem:[#allocation7 + $0x18] sm:$0xff] %v374_v9 }
  0xa7   :  { %473 = shalt.err (!%p470_p6)
}
  0xa8   :  { %s474_s10 = scalar_lea.hbm %s1043_s2, 1152 }
  0xa9   :  { %p475_p7 = scmp.ne.s32.totalorder %s1043_s2, %s474_s10  ;;  %p478_p8 = scmp.lt.u32.totalorder %s474_s10, %s1043_s2 }
  0xab   :  { %p480_p9 = pnand %p478_p8, %p475_p7 }
  0xad   :  { %483 = shalt.err (!%p480_p9)
}
  0xae   :  { %395 = dma.vmem_to_hbm [thread:$0]  %s390_s6, 1152, %s1043_s2, [#allocation4], %s491_s19, %s491_s19, %s492_s20  }
  0xaf   :  { %488 = dma.done.wait [#allocation4], 1152  }
  0xb0   :  { %489 = vsyncadd [#allocation4], 4294966144 }
  0xb1   :  { %399 = vsyncpa [#allocation3], 1 }
  0xb2   :  { %400 = vsyncpa [#allocation6], 1 }
  0xb3   :  { %401 = vsyncpa [#allocation4], 1 }

</bundles_post_ra>
